<compile_context>
chip_gen: v6e
topology: v6e:2x2x1
jax: 0.10.0
libtpu: 0.0.40
codegen_flags: <defaults>
</compile_context>

<pallas_src>
import functools

import jax
import jax.numpy as jnp
from jax.experimental import pallas as pl
from jax.experimental.pallas import tpu as pltpu


_PAD = 128  # lane padding on each side of the flattened pixel axis (>= W+1)


def _ms_stem0_kernel(x_ref, w1_ref, b1_ref, w2_ref, b2_ref, o_ref,
                     xpad_ref, p1_ref, y1pad_ref, p2_ref, *, H, W):
    """Fused stem for one image.

    x_ref   : (1, Cin, H*W)   input image, channels on sublanes, pixels on lanes
    w1_ref  : (32, 9*Cin)     stage-1 weights, BN scale pre-folded
    b1_ref  : (32, 1)         stage-1 folded BN bias
    w2_ref  : (64, 9*32)      stage-2 weights, BN scale pre-folded
    b2_ref  : (64, 1)         stage-2 folded BN bias
    o_ref   : (1, 64, H*W)    output (flattened NCHW), lane-dense
    xpad_ref / y1pad_ref      lane-padded activation scratch (C, H*W + 2*_PAD)
    p1_ref / p2_ref           im2col patch scratch (9*C, H*W)
    """
    HW = H * W

    # Zero the halo pads once; they are never written again (only the middle
    # H*W lanes are restaged per image), and scratch persists across the grid.
    @pl.when(pl.program_id(0) == 0)
    def _init_pads():
        for ref in (xpad_ref, y1pad_ref):
            c = ref.shape[0]
            ref[:, :_PAD] = jnp.zeros((c, _PAD), jnp.float32)
            ref[:, _PAD + HW:] = jnp.zeros((c, _PAD), jnp.float32)

    # w-coordinate of every flattened pixel -> masks for left/right image edge.
    wcol = jax.lax.broadcasted_iota(jnp.int32, (1, HW), 1) % W
    left_ok = wcol >= 1           # tap reads column w-1
    right_ok = wcol <= W - 2      # tap reads column w+1

    def stage(src_pad_ref, p_ref, act, w_ref, b_ref):
        c = src_pad_ref.shape[0]
        # Stage the activation into the middle of the lane-padded scratch
        # (128-lane-aligned store; pads already hold zeros).
        src_pad_ref[:, _PAD:_PAD + HW] = act

        # im2col: each 3x3 tap is a static lane-offset slice of the padded
        # activation; top/bottom halo reads land in the zero pad, only the
        # left/right image edge needs a select.
        for t, (dy, dx) in enumerate((a, b) for a in range(3) for b in range(3)):
            shift = (dy - 1) * W + (dx - 1)
            blk = src_pad_ref[:, _PAD + shift:_PAD + shift + HW]
            if dx == 0:
                blk = jnp.where(left_ok, blk, 0.0)
            elif dx == 2:
                blk = jnp.where(right_ok, blk, 0.0)
            p_ref[t * c:(t + 1) * c, :] = blk

        # One fat MXU matmul (Cout, 9*C) @ (9*C, H*W) with f32 accumulation,
        # then folded-BN bias + ReLU on the accumulator.
        acc = jnp.dot(w_ref[...], p_ref[...],
                      preferred_element_type=jnp.float32)
        return jnp.maximum(acc + b_ref[...], 0.0)

    y1 = stage(xpad_ref, p1_ref, x_ref[0].astype(jnp.float32), w1_ref, b1_ref)
    y2 = stage(y1pad_ref, p2_ref, y1, w2_ref, b2_ref)
    o_ref[0] = y2.astype(o_ref.dtype)


def ms_stem0_pallas(x_nchw, w1T, b1, w2T, b2):
    """x_nchw: (N, Cin, H, W); w1T: (32, 9*Cin); w2T: (64, 288); b*: (C, 1)."""
    N, Cin, H, W = x_nchw.shape
    HW = H * W
    assert _PAD >= W + 1, "lane pad must cover one row of conv halo"
    C1, C2 = w1T.shape[0], w2T.shape[0]          # 32, 64
    x_flat = x_nchw.reshape(N, Cin, HW).astype(jnp.float32)

    out = pl.pallas_call(
        functools.partial(_ms_stem0_kernel, H=H, W=W),
        out_shape=jax.ShapeDtypeStruct((N, C2, HW), x_nchw.dtype),
        grid=(N,),
        in_specs=[
            pl.BlockSpec((1, Cin, HW), lambda n: (n, 0, 0)),
            pl.BlockSpec((C1, 9 * Cin), lambda n: (0, 0)),
            pl.BlockSpec((C1, 1), lambda n: (0, 0)),
            pl.BlockSpec((C2, 9 * C1), lambda n: (0, 0)),
            pl.BlockSpec((C2, 1), lambda n: (0, 0)),
        ],
        out_specs=pl.BlockSpec((1, C2, HW), lambda n: (n, 0, 0)),
        scratch_shapes=[
            pltpu.VMEM((Cin, HW + 2 * _PAD), jnp.float32),   # padded input
            pltpu.VMEM((9 * Cin, HW), jnp.float32),          # stage-1 patches
            pltpu.VMEM((C1, HW + 2 * _PAD), jnp.float32),    # padded stage-1 act
            pltpu.VMEM((9 * C1, HW), jnp.float32),           # stage-2 patches
        ],
        compiler_params=pltpu.CompilerParams(
            dimension_semantics=("parallel",)),
    )(x_flat, w1T, b1, w2T, b2)
    return out.reshape(N, C2, H, W)


@jax.jit
def ms_stem0_forward(x_nchw, w1, s1, b1, w2, s2, b2):
    """Full MsStem0 forward, NCHW in / NCHW out (matches the PyTorch module)."""
    # Fold BN scale into the conv weights and lay them out as (Cout, 9*Cin)
    # for the transposed im2col matmul (ordering: tap*Cin + c).
    w1T = (w1 * s1).reshape(-1, w1.shape[-1]).T
    w2T = (w2 * s2).reshape(-1, w2.shape[-1]).T
    return ms_stem0_pallas(x_nchw, w1T, b1.reshape(-1, 1),
                           w2T, b2.reshape(-1, 1))


def _fold_bn(gamma, beta, mean, var, eps=1e-5):
    scale = gamma / jnp.sqrt(var + eps)
    bias = beta - mean * scale
    return scale.astype(jnp.float32), bias.astype(jnp.float32)


def make_params(in_channels=4):
    """Deterministic synthetic parameters matching MsStem0's shapes."""
    key = jax.random.PRNGKey(0)
    k1, k2 = jax.random.split(key)

    # conv1: (32, Cin, 3, 3) in torch -> stored HWIO (3, 3, Cin, 32)
    w1 = jax.random.normal(k1, (3, 3, in_channels, 32), jnp.float32) * 0.1
    # conv3: (64, 32, 3, 3) -> (3, 3, 32, 64)
    w2 = jax.random.normal(k2, (3, 3, 32, 64), jnp.float32) * 0.1

    g1 = 1.0 + 0.01 * jnp.arange(32, dtype=jnp.float32)
    be1 = 0.02 * jnp.arange(32, dtype=jnp.float32) - 0.3
    m1 = 0.05 * jnp.sin(jnp.arange(32, dtype=jnp.float32))
    v1 = 1.0 + 0.1 * jnp.cos(jnp.arange(32, dtype=jnp.float32)) ** 2

    g2 = 1.0 + 0.01 * jnp.arange(64, dtype=jnp.float32)
    be2 = 0.01 * jnp.arange(64, dtype=jnp.float32) - 0.2
    m2 = 0.05 * jnp.cos(jnp.arange(64, dtype=jnp.float32))
    v2 = 1.0 + 0.1 * jnp.sin(jnp.arange(64, dtype=jnp.float32)) ** 2

    s1, b1 = _fold_bn(g1, be1, m1, v1)
    s2, b2 = _fold_bn(g2, be2, m2, v2)
    return w1, s1, b1, w2, s2, b2


def _reference_forward(x_nchw, w1, s1, b1, w2, s2, b2):
    """Pure-JAX reference (lax.conv) for correctness checking."""
    def block(x, w, s, b):
        y = jax.lax.conv_general_dilated(
            x, w, window_strides=(1, 1), padding="SAME",
            dimension_numbers=("NCHW", "HWIO", "NCHW"))
        y = y * s.reshape(1, -1, 1, 1) + b.reshape(1, -1, 1, 1)
        return jnp.maximum(y, 0.0)
    return block(block(x_nchw, w1, s1, b1), w2, s2, b2)


if __name__ == "__main__":
    N, Cin, H, W = 2, 4, 16, 16
    key = jax.random.PRNGKey(0)
    x = jax.random.normal(key, (N, Cin, H, W), jnp.float32)

    params = make_params(in_channels=Cin)

    out = jax.block_until_ready(ms_stem0_forward(x, *params))
    assert out.shape == (N, 64, H, W), out.shape

    ref = _reference_forward(x, *params)
    err = float(jnp.max(jnp.abs(out - ref)))
    assert jnp.allclose(out, ref, atol=1e-4, rtol=1e-4), err

    print("KERNEL_OK")
</pallas_src>

<mosaic_0001>
module attributes {stable_mosaic.version = 11 : i64} {
  func.func @_ms_stem0_kernel(%arg0: i32, %arg1: memref<1x4x256xf32, #tpu.memory_space<vmem>>, %arg2: memref<32x36xf32, #tpu.memory_space<vmem>>, %arg3: memref<32x1xf32, #tpu.memory_space<vmem>>, %arg4: memref<64x288xf32, #tpu.memory_space<vmem>>, %arg5: memref<64x1xf32, #tpu.memory_space<vmem>>, %arg6: memref<1x64x256xf32, #tpu.memory_space<vmem>>, %arg7: memref<4x512xf32, #tpu.memory_space<vmem>>, %arg8: memref<36x256xf32, #tpu.memory_space<vmem>>, %arg9: memref<32x512xf32, #tpu.memory_space<vmem>>, %arg10: memref<288x256xf32, #tpu.memory_space<vmem>>) attributes {dimension_semantics = [#tpu.dimension_semantics<parallel>], iteration_bounds = array<i64: 2>, scalar_prefetch = 0 : i64, scratch_operands = 4 : i64, tpu.core_type = #tpu.core_type<tc>, window_params = [{transform_indices = @transform_0, window_bounds = array<i64: 1, 4, 256>}, {pipeline_mode = #tpu.pipeline_mode<synchronous>, transform_indices = @transform_1, window_bounds = array<i64: 32, 36>}, {pipeline_mode = #tpu.pipeline_mode<synchronous>, transform_indices = @transform_2, window_bounds = array<i64: 32, 1>}, {pipeline_mode = #tpu.pipeline_mode<synchronous>, transform_indices = @transform_3, window_bounds = array<i64: 64, 288>}, {pipeline_mode = #tpu.pipeline_mode<synchronous>, transform_indices = @transform_4, window_bounds = array<i64: 64, 1>}, {transform_indices = @transform_5, window_bounds = array<i64: 1, 64, 256>}]} {
    %c0_i32 = arith.constant 0 : i32
    %0 = arith.cmpi eq, %arg0, %c0_i32 : i32
    %1 = arith.extui %0 : i1 to i32
    %c0_i32_0 = arith.constant 0 : i32
    %2 = arith.cmpi ne, %1, %c0_i32_0 : i32
    scf.if %2 {
      %cst_91 = arith.constant 0.000000e+00 : f32
      %131 = vector.broadcast %cst_91 : f32 to vector<4x128xf32>
      %c0_92 = arith.constant 0 : index
      %c0_93 = arith.constant 0 : index
      %132 = vector.load %arg7[%c0_92, %c0_93] : memref<4x512xf32, #tpu.memory_space<vmem>>, vector<4x128xf32>
      tpu.vector_store %arg7[%c0_92, %c0_93], %131 {strides = array<i32>} : memref<4x512xf32, #tpu.memory_space<vmem>>, vector<4x128xf32>,
      %cst_94 = arith.constant 0.000000e+00 : f32
      %133 = vector.broadcast %cst_94 : f32 to vector<4x128xf32>
      %c0_95 = arith.constant 0 : index
      %c384 = arith.constant 384 : index
      %134 = vector.load %arg7[%c0_95, %c384] : memref<4x512xf32, #tpu.memory_space<vmem>>, vector<4x128xf32>
      tpu.vector_store %arg7[%c0_95, %c384], %133 {strides = array<i32>} : memref<4x512xf32, #tpu.memory_space<vmem>>, vector<4x128xf32>,
      %cst_96 = arith.constant 0.000000e+00 : f32
      %135 = vector.broadcast %cst_96 : f32 to vector<32x128xf32>
      %c0_97 = arith.constant 0 : index
      %c0_98 = arith.constant 0 : index
      %136 = vector.load %arg9[%c0_97, %c0_98] : memref<32x512xf32, #tpu.memory_space<vmem>>, vector<32x128xf32>
      tpu.vector_store %arg9[%c0_97, %c0_98], %135 {strides = array<i32>} : memref<32x512xf32, #tpu.memory_space<vmem>>, vector<32x128xf32>,
      %cst_99 = arith.constant 0.000000e+00 : f32
      %137 = vector.broadcast %cst_99 : f32 to vector<32x128xf32>
      %c0_100 = arith.constant 0 : index
      %c384_101 = arith.constant 384 : index
      %138 = vector.load %arg9[%c0_100, %c384_101] : memref<32x512xf32, #tpu.memory_space<vmem>>, vector<32x128xf32>
      tpu.vector_store %arg9[%c0_100, %c384_101], %137 {strides = array<i32>} : memref<32x512xf32, #tpu.memory_space<vmem>>, vector<32x128xf32>,
    } else {
    }
    %3 = tpu.iota {dimensions = array<i32: 1>} : vector<1x256xi32>
    %c16_i32 = arith.constant 16 : i32
    %c0_i32_1 = arith.constant 0 : i32
    %4 = arith.cmpi eq, %c16_i32, %c0_i32_1 : i32
    %c1_i32 = arith.constant 1 : i32
    %5 = arith.select %4, %c1_i32, %c16_i32 : i32
    %6 = vector.broadcast %5 : i32 to vector<1x256xi32>
    %7 = arith.remsi %3, %6 : vector<1x256xi32>
    %c0_i32_2 = arith.constant 0 : i32
    %8 = vector.broadcast %c0_i32_2 : i32 to vector<1x256xi32>
    %9 = arith.cmpi ne, %7, %8 : vector<1x256xi32>
    %c0_i32_3 = arith.constant 0 : i32
    %10 = vector.broadcast %c0_i32_3 : i32 to vector<1x256xi32>
    %11 = arith.cmpi slt, %7, %10 : vector<1x256xi32>
    %c0_i32_4 = arith.constant 0 : i32
    %12 = arith.cmpi slt, %5, %c0_i32_4 : i32
    %13 = vector.broadcast %12 : i1 to vector<1x256xi1>
    %14 = vector.broadcast %13 : vector<1x256xi1> to vector<1x256xi1>
    %15 = arith.xori %11, %14 : vector<1x256xi1>
    %16 = arith.andi %15, %9 : vector<1x256xi1>
    %17 = vector.broadcast %5 : i32 to vector<1x256xi32>
    %18 = arith.addi %7, %17 : vector<1x256xi32>
    %19 = arith.select %16, %18, %7 : vector<1x256xi1>, vector<1x256xi32>
    %c1_i32_5 = arith.constant 1 : i32
    %20 = vector.broadcast %c1_i32_5 : i32 to vector<1x256xi32>
    %21 = arith.cmpi sge, %19, %20 : vector<1x256xi32>
    %c14_i32 = arith.constant 14 : i32
    %22 = vector.broadcast %c14_i32 : i32 to vector<1x256xi32>
    %23 = arith.cmpi sle, %19, %22 : vector<1x256xi32>
    %c0 = arith.constant 0 : index
    %c0_6 = arith.constant 0 : index
    %c0_7 = arith.constant 0 : index
    %24 = vector.load %arg1[%c0, %c0_6, %c0_7] : memref<1x4x256xf32, #tpu.memory_space<vmem>>, vector<1x4x256xf32>
    %25 = vector.shape_cast %24 : vector<1x4x256xf32> to vector<4x256xf32>
    %c0_8 = arith.constant 0 : index
    %c128 = arith.constant 128 : index
    %26 = vector.load %arg7[%c0_8, %c128] : memref<4x512xf32, #tpu.memory_space<vmem>>, vector<4x256xf32>
    tpu.vector_store %arg7[%c0_8, %c128], %25 {strides = array<i32>} : memref<4x512xf32, #tpu.memory_space<vmem>>, vector<4x256xf32>,
    %c0_9 = arith.constant 0 : index
    %c111 = arith.constant 111 : index
    %27 = vector.load %arg7[%c0_9, %c111] : memref<4x512xf32, #tpu.memory_space<vmem>>, vector<4x256xf32>
    %cst = arith.constant 0.000000e+00 : f32
    %28 = vector.shape_cast %21 : vector<1x256xi1> to vector<1x256xi1>
    %29 = vector.broadcast %28 : vector<1x256xi1> to vector<4x256xi1>
    %30 = vector.broadcast %cst : f32 to vector<4x256xf32>
    %31 = arith.select %29, %27, %30 : vector<4x256xi1>, vector<4x256xf32>
    %c0_10 = arith.constant 0 : index
    %c0_11 = arith.constant 0 : index
    %32 = vector.load %arg8[%c0_10, %c0_11] : memref<36x256xf32, #tpu.memory_space<vmem>>, vector<4x256xf32>
    tpu.vector_store %arg8[%c0_10, %c0_11], %31 {strides = array<i32>} : memref<36x256xf32, #tpu.memory_space<vmem>>, vector<4x256xf32>,
    %c0_12 = arith.constant 0 : index
    %c112 = arith.constant 112 : index
    %33 = vector.load %arg7[%c0_12, %c112] : memref<4x512xf32, #tpu.memory_space<vmem>>, vector<4x256xf32>
    %c4 = arith.constant 4 : index
    %c0_13 = arith.constant 0 : index
    %34 = vector.load %arg8[%c4, %c0_13] : memref<36x256xf32, #tpu.memory_space<vmem>>, vector<4x256xf32>
    tpu.vector_store %arg8[%c4, %c0_13], %33 {strides = array<i32>} : memref<36x256xf32, #tpu.memory_space<vmem>>, vector<4x256xf32>,
    %c0_14 = arith.constant 0 : index
    %c113 = arith.constant 113 : index
    %35 = vector.load %arg7[%c0_14, %c113] : memref<4x512xf32, #tpu.memory_space<vmem>>, vector<4x256xf32>
    %cst_15 = arith.constant 0.000000e+00 : f32
    %36 = vector.shape_cast %23 : vector<1x256xi1> to vector<1x256xi1>
    %37 = vector.broadcast %36 : vector<1x256xi1> to vector<4x256xi1>
    %38 = vector.broadcast %cst_15 : f32 to vector<4x256xf32>
    %39 = arith.select %37, %35, %38 : vector<4x256xi1>, vector<4x256xf32>
    %c8 = arith.constant 8 : index
    %c0_16 = arith.constant 0 : index
    %40 = vector.load %arg8[%c8, %c0_16] : memref<36x256xf32, #tpu.memory_space<vmem>>, vector<4x256xf32>
    tpu.vector_store %arg8[%c8, %c0_16], %39 {strides = array<i32>} : memref<36x256xf32, #tpu.memory_space<vmem>>, vector<4x256xf32>,
    %c0_17 = arith.constant 0 : index
    %c127 = arith.constant 127 : index
    %41 = vector.load %arg7[%c0_17, %c127] : memref<4x512xf32, #tpu.memory_space<vmem>>, vector<4x256xf32>
    %cst_18 = arith.constant 0.000000e+00 : f32
    %42 = vector.shape_cast %21 : vector<1x256xi1> to vector<1x256xi1>
    %43 = vector.broadcast %42 : vector<1x256xi1> to vector<4x256xi1>
    %44 = vector.broadcast %cst_18 : f32 to vector<4x256xf32>
    %45 = arith.select %43, %41, %44 : vector<4x256xi1>, vector<4x256xf32>
    %c12 = arith.constant 12 : index
    %c0_19 = arith.constant 0 : index
    %46 = vector.load %arg8[%c12, %c0_19] : memref<36x256xf32, #tpu.memory_space<vmem>>, vector<4x256xf32>
    tpu.vector_store %arg8[%c12, %c0_19], %45 {strides = array<i32>} : memref<36x256xf32, #tpu.memory_space<vmem>>, vector<4x256xf32>,
    %c0_20 = arith.constant 0 : index
    %c128_21 = arith.constant 128 : index
    %47 = vector.load %arg7[%c0_20, %c128_21] : memref<4x512xf32, #tpu.memory_space<vmem>>, vector<4x256xf32>
    %c16 = arith.constant 16 : index
    %c0_22 = arith.constant 0 : index
    %48 = vector.load %arg8[%c16, %c0_22] : memref<36x256xf32, #tpu.memory_space<vmem>>, vector<4x256xf32>
    tpu.vector_store %arg8[%c16, %c0_22], %47 {strides = array<i32>} : memref<36x256xf32, #tpu.memory_space<vmem>>, vector<4x256xf32>,
    %c0_23 = arith.constant 0 : index
    %c129 = arith.constant 129 : index
    %49 = vector.load %arg7[%c0_23, %c129] : memref<4x512xf32, #tpu.memory_space<vmem>>, vector<4x256xf32>
    %cst_24 = arith.constant 0.000000e+00 : f32
    %50 = vector.shape_cast %23 : vector<1x256xi1> to vector<1x256xi1>
    %51 = vector.broadcast %50 : vector<1x256xi1> to vector<4x256xi1>
    %52 = vector.broadcast %cst_24 : f32 to vector<4x256xf32>
    %53 = arith.select %51, %49, %52 : vector<4x256xi1>, vector<4x256xf32>
    %c20 = arith.constant 20 : index
    %c0_25 = arith.constant 0 : index
    %54 = vector.load %arg8[%c20, %c0_25] : memref<36x256xf32, #tpu.memory_space<vmem>>, vector<4x256xf32>
    tpu.vector_store %arg8[%c20, %c0_25], %53 {strides = array<i32>} : memref<36x256xf32, #tpu.memory_space<vmem>>, vector<4x256xf32>,
    %c0_26 = arith.constant 0 : index
    %c143 = arith.constant 143 : index
    %55 = vector.load %arg7[%c0_26, %c143] : memref<4x512xf32, #tpu.memory_space<vmem>>, vector<4x256xf32>
    %cst_27 = arith.constant 0.000000e+00 : f32
    %56 = vector.shape_cast %21 : vector<1x256xi1> to vector<1x256xi1>
    %57 = vector.broadcast %56 : vector<1x256xi1> to vector<4x256xi1>
    %58 = vector.broadcast %cst_27 : f32 to vector<4x256xf32>
    %59 = arith.select %57, %55, %58 : vector<4x256xi1>, vector<4x256xf32>
    %c24 = arith.constant 24 : index
    %c0_28 = arith.constant 0 : index
    %60 = vector.load %arg8[%c24, %c0_28] : memref<36x256xf32, #tpu.memory_space<vmem>>, vector<4x256xf32>
    tpu.vector_store %arg8[%c24, %c0_28], %59 {strides = array<i32>} : memref<36x256xf32, #tpu.memory_space<vmem>>, vector<4x256xf32>,
    %c0_29 = arith.constant 0 : index
    %c144 = arith.constant 144 : index
    %61 = vector.load %arg7[%c0_29, %c144] : memref<4x512xf32, #tpu.memory_space<vmem>>, vector<4x256xf32>
    %c28 = arith.constant 28 : index
    %c0_30 = arith.constant 0 : index
    %62 = vector.load %arg8[%c28, %c0_30] : memref<36x256xf32, #tpu.memory_space<vmem>>, vector<4x256xf32>
    tpu.vector_store %arg8[%c28, %c0_30], %61 {strides = array<i32>} : memref<36x256xf32, #tpu.memory_space<vmem>>, vector<4x256xf32>,
    %c0_31 = arith.constant 0 : index
    %c145 = arith.constant 145 : index
    %63 = vector.load %arg7[%c0_31, %c145] : memref<4x512xf32, #tpu.memory_space<vmem>>, vector<4x256xf32>
    %cst_32 = arith.constant 0.000000e+00 : f32
    %64 = vector.shape_cast %23 : vector<1x256xi1> to vector<1x256xi1>
    %65 = vector.broadcast %64 : vector<1x256xi1> to vector<4x256xi1>
    %66 = vector.broadcast %cst_32 : f32 to vector<4x256xf32>
    %67 = arith.select %65, %63, %66 : vector<4x256xi1>, vector<4x256xf32>
    %c32 = arith.constant 32 : index
    %c0_33 = arith.constant 0 : index
    %68 = vector.load %arg8[%c32, %c0_33] : memref<36x256xf32, #tpu.memory_space<vmem>>, vector<4x256xf32>
    tpu.vector_store %arg8[%c32, %c0_33], %67 {strides = array<i32>} : memref<36x256xf32, #tpu.memory_space<vmem>>, vector<4x256xf32>,
    %c0_34 = arith.constant 0 : index
    %c0_35 = arith.constant 0 : index
    %69 = vector.load %arg2[%c0_34, %c0_35] : memref<32x36xf32, #tpu.memory_space<vmem>>, vector<32x36xf32>
    %c0_36 = arith.constant 0 : index
    %c0_37 = arith.constant 0 : index
    %70 = vector.load %arg8[%c0_36, %c0_37] : memref<36x256xf32, #tpu.memory_space<vmem>>, vector<36x256xf32>
    %cst_38 = arith.constant dense<0.000000e+00> : vector<32x256xf32>
    %71 = tpu.matmul %69, %70, %cst_38 {dimension_numbers = #tpu.dot_dimension_numbers<[1], [0], [0], [1], [0, 0, 1, 1], [], []>} : vector<32x36xf32>, vector<36x256xf32>, vector<32x256xf32> -> vector<32x256xf32>
    %c0_39 = arith.constant 0 : index
    %c0_40 = arith.constant 0 : index
    %72 = vector.load %arg3[%c0_39, %c0_40] : memref<32x1xf32, #tpu.memory_space<vmem>>, vector<32x1xf32>
    %73 = vector.broadcast %72 : vector<32x1xf32> to vector<32x256xf32>
    %74 = arith.addf %71, %73 : vector<32x256xf32>
    %cst_41 = arith.constant 0.000000e+00 : f32
    %75 = vector.broadcast %cst_41 : f32 to vector<32x256xf32>
    %76 = arith.maximumf %74, %75 : vector<32x256xf32>
    %c0_42 = arith.constant 0 : index
    %c128_43 = arith.constant 128 : index
    %77 = vector.load %arg9[%c0_42, %c128_43] : memref<32x512xf32, #tpu.memory_space<vmem>>, vector<32x256xf32>
    tpu.vector_store %arg9[%c0_42, %c128_43], %76 {strides = array<i32>} : memref<32x512xf32, #tpu.memory_space<vmem>>, vector<32x256xf32>,
    %c0_44 = arith.constant 0 : index
    %c111_45 = arith.constant 111 : index
    %78 = vector.load %arg9[%c0_44, %c111_45] : memref<32x512xf32, #tpu.memory_space<vmem>>, vector<32x256xf32>
    %cst_46 = arith.constant 0.000000e+00 : f32
    %79 = vector.shape_cast %21 : vector<1x256xi1> to vector<1x256xi1>
    %80 = vector.broadcast %79 : vector<1x256xi1> to vector<32x256xi1>
    %81 = vector.broadcast %cst_46 : f32 to vector<32x256xf32>
    %82 = arith.select %80, %78, %81 : vector<32x256xi1>, vector<32x256xf32>
    %c0_47 = arith.constant 0 : index
    %c0_48 = arith.constant 0 : index
    %83 = vector.load %arg10[%c0_47, %c0_48] : memref<288x256xf32, #tpu.memory_space<vmem>>, vector<32x256xf32>
    tpu.vector_store %arg10[%c0_47, %c0_48], %82 {strides = array<i32>} : memref<288x256xf32, #tpu.memory_space<vmem>>, vector<32x256xf32>,
    %c0_49 = arith.constant 0 : index
    %c112_50 = arith.constant 112 : index
    %84 = vector.load %arg9[%c0_49, %c112_50] : memref<32x512xf32, #tpu.memory_space<vmem>>, vector<32x256xf32>
    %c32_51 = arith.constant 32 : index
    %c0_52 = arith.constant 0 : index
    %85 = vector.load %arg10[%c32_51, %c0_52] : memref<288x256xf32, #tpu.memory_space<vmem>>, vector<32x256xf32>
    tpu.vector_store %arg10[%c32_51, %c0_52], %84 {strides = array<i32>} : memref<288x256xf32, #tpu.memory_space<vmem>>, vector<32x256xf32>,
    %c0_53 = arith.constant 0 : index
    %c113_54 = arith.constant 113 : index
    %86 = vector.load %arg9[%c0_53, %c113_54] : memref<32x512xf32, #tpu.memory_space<vmem>>, vector<32x256xf32>
    %cst_55 = arith.constant 0.000000e+00 : f32
    %87 = vector.shape_cast %23 : vector<1x256xi1> to vector<1x256xi1>
    %88 = vector.broadcast %87 : vector<1x256xi1> to vector<32x256xi1>
    %89 = vector.broadcast %cst_55 : f32 to vector<32x256xf32>
    %90 = arith.select %88, %86, %89 : vector<32x256xi1>, vector<32x256xf32>
    %c64 = arith.constant 64 : index
    %c0_56 = arith.constant 0 : index
    %91 = vector.load %arg10[%c64, %c0_56] : memref<288x256xf32, #tpu.memory_space<vmem>>, vector<32x256xf32>
    tpu.vector_store %arg10[%c64, %c0_56], %90 {strides = array<i32>} : memref<288x256xf32, #tpu.memory_space<vmem>>, vector<32x256xf32>,
    %c0_57 = arith.constant 0 : index
    %c127_58 = arith.constant 127 : index
    %92 = vector.load %arg9[%c0_57, %c127_58] : memref<32x512xf32, #tpu.memory_space<vmem>>, vector<32x256xf32>
    %cst_59 = arith.constant 0.000000e+00 : f32
    %93 = vector.shape_cast %21 : vector<1x256xi1> to vector<1x256xi1>
    %94 = vector.broadcast %93 : vector<1x256xi1> to vector<32x256xi1>
    %95 = vector.broadcast %cst_59 : f32 to vector<32x256xf32>
    %96 = arith.select %94, %92, %95 : vector<32x256xi1>, vector<32x256xf32>
    %c96 = arith.constant 96 : index
    %c0_60 = arith.constant 0 : index
    %97 = vector.load %arg10[%c96, %c0_60] : memref<288x256xf32, #tpu.memory_space<vmem>>, vector<32x256xf32>
    tpu.vector_store %arg10[%c96, %c0_60], %96 {strides = array<i32>} : memref<288x256xf32, #tpu.memory_space<vmem>>, vector<32x256xf32>,
    %c0_61 = arith.constant 0 : index
    %c128_62 = arith.constant 128 : index
    %98 = vector.load %arg9[%c0_61, %c128_62] : memref<32x512xf32, #tpu.memory_space<vmem>>, vector<32x256xf32>
    %c128_63 = arith.constant 128 : index
    %c0_64 = arith.constant 0 : index
    %99 = vector.load %arg10[%c128_63, %c0_64] : memref<288x256xf32, #tpu.memory_space<vmem>>, vector<32x256xf32>
    tpu.vector_store %arg10[%c128_63, %c0_64], %98 {strides = array<i32>} : memref<288x256xf32, #tpu.memory_space<vmem>>, vector<32x256xf32>,
    %c0_65 = arith.constant 0 : index
    %c129_66 = arith.constant 129 : index
    %100 = vector.load %arg9[%c0_65, %c129_66] : memref<32x512xf32, #tpu.memory_space<vmem>>, vector<32x256xf32>
    %cst_67 = arith.constant 0.000000e+00 : f32
    %101 = vector.shape_cast %23 : vector<1x256xi1> to vector<1x256xi1>
    %102 = vector.broadcast %101 : vector<1x256xi1> to vector<32x256xi1>
    %103 = vector.broadcast %cst_67 : f32 to vector<32x256xf32>
    %104 = arith.select %102, %100, %103 : vector<32x256xi1>, vector<32x256xf32>
    %c160 = arith.constant 160 : index
    %c0_68 = arith.constant 0 : index
    %105 = vector.load %arg10[%c160, %c0_68] : memref<288x256xf32, #tpu.memory_space<vmem>>, vector<32x256xf32>
    tpu.vector_store %arg10[%c160, %c0_68], %104 {strides = array<i32>} : memref<288x256xf32, #tpu.memory_space<vmem>>, vector<32x256xf32>,
    %c0_69 = arith.constant 0 : index
    %c143_70 = arith.constant 143 : index
    %106 = vector.load %arg9[%c0_69, %c143_70] : memref<32x512xf32, #tpu.memory_space<vmem>>, vector<32x256xf32>
    %cst_71 = arith.constant 0.000000e+00 : f32
    %107 = vector.shape_cast %21 : vector<1x256xi1> to vector<1x256xi1>
    %108 = vector.broadcast %107 : vector<1x256xi1> to vector<32x256xi1>
    %109 = vector.broadcast %cst_71 : f32 to vector<32x256xf32>
    %110 = arith.select %108, %106, %109 : vector<32x256xi1>, vector<32x256xf32>
    %c192 = arith.constant 192 : index
    %c0_72 = arith.constant 0 : index
    %111 = vector.load %arg10[%c192, %c0_72] : memref<288x256xf32, #tpu.memory_space<vmem>>, vector<32x256xf32>
    tpu.vector_store %arg10[%c192, %c0_72], %110 {strides = array<i32>} : memref<288x256xf32, #tpu.memory_space<vmem>>, vector<32x256xf32>,
    %c0_73 = arith.constant 0 : index
    %c144_74 = arith.constant 144 : index
    %112 = vector.load %arg9[%c0_73, %c144_74] : memref<32x512xf32, #tpu.memory_space<vmem>>, vector<32x256xf32>
    %c224 = arith.constant 224 : index
    %c0_75 = arith.constant 0 : index
    %113 = vector.load %arg10[%c224, %c0_75] : memref<288x256xf32, #tpu.memory_space<vmem>>, vector<32x256xf32>
    tpu.vector_store %arg10[%c224, %c0_75], %112 {strides = array<i32>} : memref<288x256xf32, #tpu.memory_space<vmem>>, vector<32x256xf32>,
    %c0_76 = arith.constant 0 : index
    %c145_77 = arith.constant 145 : index
    %114 = vector.load %arg9[%c0_76, %c145_77] : memref<32x512xf32, #tpu.memory_space<vmem>>, vector<32x256xf32>
    %cst_78 = arith.constant 0.000000e+00 : f32
    %115 = vector.shape_cast %23 : vector<1x256xi1> to vector<1x256xi1>
    %116 = vector.broadcast %115 : vector<1x256xi1> to vector<32x256xi1>
    %117 = vector.broadcast %cst_78 : f32 to vector<32x256xf32>
    %118 = arith.select %116, %114, %117 : vector<32x256xi1>, vector<32x256xf32>
    %c256 = arith.constant 256 : index
    %c0_79 = arith.constant 0 : index
    %119 = vector.load %arg10[%c256, %c0_79] : memref<288x256xf32, #tpu.memory_space<vmem>>, vector<32x256xf32>
    tpu.vector_store %arg10[%c256, %c0_79], %118 {strides = array<i32>} : memref<288x256xf32, #tpu.memory_space<vmem>>, vector<32x256xf32>,
    %c0_80 = arith.constant 0 : index
    %c0_81 = arith.constant 0 : index
    %120 = vector.load %arg4[%c0_80, %c0_81] : memref<64x288xf32, #tpu.memory_space<vmem>>, vector<64x288xf32>
    %c0_82 = arith.constant 0 : index
    %c0_83 = arith.constant 0 : index
    %121 = vector.load %arg10[%c0_82, %c0_83] : memref<288x256xf32, #tpu.memory_space<vmem>>, vector<288x256xf32>
    %cst_84 = arith.constant dense<0.000000e+00> : vector<64x256xf32>
    %122 = tpu.matmul %120, %121, %cst_84 {dimension_numbers = #tpu.dot_dimension_numbers<[1], [0], [0], [1], [0, 0, 1, 1], [], []>} : vector<64x288xf32>, vector<288x256xf32>, vector<64x256xf32> -> vector<64x256xf32>
    %c0_85 = arith.constant 0 : index
    %c0_86 = arith.constant 0 : index
    %123 = vector.load %arg5[%c0_85, %c0_86] : memref<64x1xf32, #tpu.memory_space<vmem>>, vector<64x1xf32>
    %124 = vector.broadcast %123 : vector<64x1xf32> to vector<64x256xf32>
    %125 = arith.addf %122, %124 : vector<64x256xf32>
    %cst_87 = arith.constant 0.000000e+00 : f32
    %126 = vector.broadcast %cst_87 : f32 to vector<64x256xf32>
    %127 = arith.maximumf %125, %126 : vector<64x256xf32>
    %c0_88 = arith.constant 0 : index
    %c0_89 = arith.constant 0 : index
    %c0_90 = arith.constant 0 : index
    %128 = vector.load %arg6[%c0_88, %c0_89, %c0_90] : memref<1x64x256xf32, #tpu.memory_space<vmem>>, vector<1x64x256xf32>
    %129 = vector.shape_cast %128 : vector<1x64x256xf32> to vector<64x256xf32>
    %130 = vector.shape_cast %127 : vector<64x256xf32> to vector<1x64x256xf32>
    tpu.vector_store %arg6[%c0_88, %c0_89, %c0_90], %130 {strides = array<i32>} : memref<1x64x256xf32, #tpu.memory_space<vmem>>, vector<1x64x256xf32>,
    return
  }
  func.func @transform_0(%arg0: i32) -> (i32, i32, i32) {
    %c0_i32 = arith.constant 0 : i32
    %c0_i32_0 = arith.constant 0 : i32
    %c0_i32_1 = arith.constant 0 : i32
    return %arg0, %c0_i32, %c0_i32_0 : i32, i32, i32
  }
  func.func @transform_1(%arg0: i32) -> (i32, i32) {
    %c0_i32 = arith.constant 0 : i32
    %c0_i32_0 = arith.constant 0 : i32
    %c0_i32_1 = arith.constant 0 : i32
    return %c0_i32, %c0_i32_0 : i32, i32
  }
  func.func @transform_2(%arg0: i32) -> (i32, i32) {
    %c0_i32 = arith.constant 0 : i32
    %c0_i32_0 = arith.constant 0 : i32
    %c0_i32_1 = arith.constant 0 : i32
    return %c0_i32, %c0_i32_0 : i32, i32
  }
  func.func @transform_3(%arg0: i32) -> (i32, i32) {
    %c0_i32 = arith.constant 0 : i32
    %c0_i32_0 = arith.constant 0 : i32
    %c0_i32_1 = arith.constant 0 : i32
    return %c0_i32, %c0_i32_0 : i32, i32
  }
  func.func @transform_4(%arg0: i32) -> (i32, i32) {
    %c0_i32 = arith.constant 0 : i32
    %c0_i32_0 = arith.constant 0 : i32
    %c0_i32_1 = arith.constant 0 : i32
    return %c0_i32, %c0_i32_0 : i32, i32
  }
  func.func @transform_5(%arg0: i32) -> (i32, i32, i32) {
    %c0_i32 = arith.constant 0 : i32
    %c0_i32_0 = arith.constant 0 : i32
    %c0_i32_1 = arith.constant 0 : i32
    return %arg0, %c0_i32, %c0_i32_0 : i32, i32, i32
  }
}

</mosaic_0001>

<bundles_post_ra>
// kernel: ms_stem0_forward.1
= control target key start
LH: loop header
LB: loop body
LE: loop exit
PB: predicated region body
PF: predicated region fallthrough
CT: control target
= control target key end

     0   :  { %s1893_s18 = smov 0   ;;  %s2698_s0 = inlined_call_operand.vmem [shape: f32[2,4,256], index: 0, kind: input, shape index: {}]   ;;  %s2699_s1 = inlined_call_operand.vmem [shape: f32[32,36], index: 1, kind: input, shape index: {}]   ;;  %s2700_s2 = inlined_call_operand.vmem [shape: f32[32,1], index: 2, kind: input, shape index: {}]   ;;  %s2701_s3 = inlined_call_operand.vmem [shape: f32[64,288], index: 3, kind: input, shape index: {}]   ;;  %s2702_s4 = inlined_call_operand.vmem [shape: f32[64,1], index: 4, kind: input, shape index: {}]   ;;  %s2703_s5 = inlined_call_operand.vmem [shape: f32[2,64,256], index: 5, kind: output, shape index: {}]  }
   0x1 LB: > { %s1741_s19 = sadd.s32 4294967295, %s1850_s18   ;;  %p1745_p0 = scmp.ge.s32.totalorder %s1850_s18, 1  ;;  %s1850_s18 = sphi %s1893_s18, %s15_s18  }
   0x2   : > { %p187_p1 = scmp.lt.s32.totalorder %s1850_s18, 3 }
   0x4   : > { %p188_p2 = pnand %p1745_p0, %p187_p1 }
   0x6   : > { %191 = sbr.rel (%p188_p2) target bundleno = 887 (0x377), region = 40 }
   0xb   : > { %p215_p3 = scmp.lt.s32.totalorder %s1741_s19, 1  ;;  %p1750_p4 = scmp.ne.s32.totalorder %s1741_s19, 0 }
   0xd   : > { %s216_s20 = scalar_select %p215_p3, %s1741_s19, 1 }
   0xe   : > { %228 = sbr.rel (%p1750_p4) target bundleno = 25 (0x19), region = 44 }
   0xf   : > { %s1767_s21 = sshll.u32 %s216_s20, 3  ;;  %s1768_s22 = sshll.u32 %s216_s20, 7 }
  0x10   : > { %s219_s25 = scalar_lea.vmem %s2698_s0, %s1767_s21  ;;  %s1907_s28 = scalar_lea.vmem %s2703_s5, %s1768_s22 }
  0x13   : > { %v1852_v0 = vmov 0.0  }
  0x14   : > { %229 = vst [vmem:[#allocation2] sm:$0xf] %v1852_v0  ;;  %230 = vst [vmem:[#allocation2 + $0xc] sm:$0xf] %v1852_v0 }
  0x15   : > { %231 = vst [vmem:[#allocation4 + $0x10] sm:$0xff] %v1852_v0  ;;  %232 = vst [vmem:[#allocation4 + $0x28] sm:$0xff] %v1852_v0 }
  0x16   : > { %233 = vst [vmem:[#allocation4 + $0x20] sm:$0xff] %v1852_v0  ;;  %234 = vst [vmem:[#allocation4 + $0x30] sm:$0xff] %v1852_v0 }
  0x17   : > { %235 = vst [vmem:[#allocation4 + $0x78] sm:$0xff] %v1852_v0  ;;  %236 = vst [vmem:[#allocation4 + $0x40] sm:$0xff] %v1852_v0 }
  0x18   : > { %237 = vst [vmem:[#allocation4 + $0x58] sm:$0xff] %v1852_v0  ;;  %238 = vst [vmem:[#allocation4 + $0x48] sm:$0xff] %v1852_v0 }
  0x19 PF: > { %s1853_s29 = smov 111   ;;  %v270_v2 = vld [vmem:[%s219_s25] sm:$0xff]  ;;  %s1854_s30 = smov 127   ;;  %v2704_v15 = vmov 0.0   ;;  %v473_v16 = vld [vmem:[%s2700_s2 + $0x18] sm:$0xff]  ;;  %v472_v17 = vld [vmem:[%s2700_s2 + $0x10] sm:$0xff]  ;;  %v239_v26 = vlaneseq }
  0x1a   : > { %271 = vst [vmem:[#allocation2 + $0x4] sm:$0xff] %v270_v2  ;;  %441 = vrot.lane.b32.xlu1 %v270_v2, %s1853_s29  ;;  %v440_v4 = vcombine.high %v270_v2, %v270_v2  ;;  %369 = vst [vmem:[#allocation3 + $0x48] sm:$0xf] %v270_v2  ;;  %s1855_s6 = smov 113   ;;  %s1856_s7 = smov 112   ;;  %v421_v9 = vcombine.low %v270_v2, %v270_v2  ;;  %578 = vmatprep.mubr.f32.mxu0 %v2704_v15  ;;  %v1862_v18 = vmov 0  }
  0x1b   : > { %v437_v1 = vld [vmem:[#allocation2 + $0xc] sm:$0xf]  ;;  %s1857_s8 = smov 1   ;;  %s1858_s9 = smov 15   ;;  %1836 = vset.pattern.permute.xlu0 %v1862_v18  ;;  %1837 = vset.pattern.permute.xlu1 %v1862_v18  ;;  %v470_v19 = vld [vmem:[%s2700_s2] sm:$0xff]  ;;  %v240_v27 = vand.u32 127, %v239_v26 }
  0x1c   : > { %445 = vrot.lane.b32.xlu0 %v437_v1, %s1853_s29  ;;  %v372_v3 = vld [vmem:[#allocation2 + $0xc] sm:$0xf]  ;;  %370 = vst [vmem:[#allocation3 + $0x28] sm:$0xf] %v440_v4  ;;  %s1859_s10 = smov 17   ;;  %s1860_s11 = smov 16  }
  0x1d   : > { %v398_v5 = vld [vmem:[#allocation2 + $0xc] sm:$0xf]  ;;  %v857_v21 = vld [vmem:[#allocation4 + $0x20] sm:$0xff]  ;;  %v860_v22 = vld [vmem:[#allocation4 + $0x30] sm:$0xff]  ;;  %v241_v28 = vadd.s32 128, %v240_v27  ;;  %v246_v32 = vand.u32 15, %v240_v27 }
  0x1e   : > { %378 = vrot.lane.b32.xlu1 %v440_v4, %s1854_s30  ;;  %v1839_v7 = vld [vmem:[#allocation2 + $0xc] ss:$0 sps:$4 sm:$0xff]   ;;  %v851_v23 = vld [vmem:[#allocation4 + $0x10] sm:$0xff]  ;;  %vm382_vm0 = vcmask 1039360   ;;  %vm447_vm2 = vcmask 908288   ;;  %vm408_vm4 = vcmask 924672  }
  0x1f   : > { %v471_v20 = vld [vmem:[%s2700_s2 + $0x8] sm:$0xff]  ;;  %v253_v30 = vand.u32 15, %v241_v28  ;;  %vm1971_vm3 = vcmp.le.s32.totalorder %v246_v32, 14  ;;  %vm1991_vm6 = vcmp.ge.s32.totalorder %v246_v32, 1  ;;  %vm507_vm7 = vcmask 1043456   ;;  %v1265_v37 = vld [vmem:[%s2701_s3 + $0x30] sm:$0xff] }
  0x20   : > { %380 = vrot.lane.b32.xlu0 %v372_v3, %s1854_s30  ;;  %v854_v24 = vld [vmem:[#allocation4 + $0x28] sm:$0xff]  ;;  %vm429_vm8 = vcmask 916480   ;;  %vm350_vm9 = vcmask 7168   ;;  %vm330_vm10 = vcmask 121856   ;;  %vm287_vm11 = vcmask 138240  }
  0x21   : > { %v339_v6 = vld [vmem:[#allocation2] sm:$0xff]  ;;  %v340_v10 = vld [vmem:[#allocation2 + $0x8] sm:$0xf]  ;;  %vm1966_vm1 = vcmp.le.s32.totalorder %v253_v30, 14  ;;  %vm1983_vm5 = vcmp.ge.s32.totalorder %v253_v30, 1  ;;  %vm308_vm12 = vcmask 130048  }
  0x22   : > { %404 = vrot.lane.b32.xlu1 %v440_v4, %s1855_s6  ;;  %v343_v8 = vcombine.high %v339_v6, %v339_v6  ;;  %v316_v11 = vld [vmem:[#allocation2 + $0x8] sm:$0xf]  ;;  %v300_v14 = vcombine.low %v339_v6, %v339_v6  ;;  %vm494_vm13 = vcmask 293888   ;;  %vm1403_vm14 = vcmask 261120  }
  0x23   : > { %v273_v12 = vld [vmem:[#allocation2 + $0x8] sm:$0xf] }
  0x24   : > { %443 = vrot.lane.b32.xlu0 %v440_v4, %s1853_s29  ;;  %v1843_v13 = vld [vmem:[#allocation2 + $0x8] ss:$0 sps:$4 sm:$0xff]  }
  0x25   : > { %v1962_v25 = vld [vmem:[#allocation4 + $0x48] sm:$0xff] }
  0x26   : > { %376 = vrot.lane.b32.xlu1 %v270_v2, %s1854_s30  ;;  %v1264_v34 = vld [vmem:[%s2701_s3 + $0x28] sm:$0xff] }
  0x28   : > { %406 = vrot.lane.b32.xlu0 %v398_v5, %s1855_s6 }
  0x2a   : > { %425 = vrot.lane.b32.xlu1 %v270_v2, %s1856_s7 }
  0x2c   : > { %402 = vrot.lane.b32.xlu0 %v270_v2, %s1855_s6 }
  0x2e   : > { %346 = vrot.lane.b32.xlu1 %v343_v8, %s1857_s8 }
  0x30   : > { %427 = vrot.lane.b32.xlu0 %v1839_v7, %s1856_s7 }
  0x32   : > { %423 = vrot.lane.b32.xlu1 %v421_v9, %s1856_s7 }
  0x34   : > { %348 = vrot.lane.b32.xlu0 %v340_v10, %s1857_s8 }
  0x36   : > { %326 = vrot.lane.b32.xlu1 %v343_v8, %s1858_s9 }
  0x38   : > { %344 = vrot.lane.b32.xlu0 %v339_v6, %s1857_s8 }
  0x3a   : > { %324 = vrot.lane.b32.xlu1 %v339_v6, %s1858_s9 }
  0x3c   : > { %328 = vrot.lane.b32.xlu0 %v316_v11, %s1858_s9 }
  0x3e   : > { %285 = vrot.lane.b32.xlu1 %v273_v12, %s1859_s10 }
  0x40   : > { %283 = vrot.lane.b32.xlu0 %v343_v8, %s1859_s10 }
  0x42   : > { %304 = vrot.lane.b32.xlu1 %v339_v6, %s1860_s11 }
  0x44   : > { %281 = vrot.lane.b32.xlu0 %v339_v6, %s1859_s10 }
  0x46   : > { %302 = vrot.lane.b32.xlu1 %v300_v14, %s1860_s11 }
  0x48   : > { %306 = vrot.lane.b32.xlu0 %v1843_v13, %s1860_s11 }
  0x4a   : > { %486 = vperm.xlu1 %1837, %v472_v17  }
  0x4c   : > { %491 = vperm.xlu0 %1836, %v473_v16  }
  0x4e   : > { %481 = vperm.xlu1 %1837, %v471_v20  }
  0x50   : > { %476 = vperm.xlu0 %1836, %v470_v19  }
  0x52   : > { %893 = vrot.lane.b32.xlu1 %v860_v22, %s1857_s8 }
  0x54   : > { %887 = vrot.lane.b32.xlu0 %v857_v21, %s1857_s8 }
  0x56   : > { %881 = vrot.lane.b32.xlu1 %v854_v24, %s1857_s8 }
  0x58   : > { %875 = vrot.lane.b32.xlu0 %v851_v23, %s1857_s8 }
  0x5a   : > { %813 = vrot.lane.b32.xlu1 %v860_v22, %s1858_s9 }
  0x5c   : > { %807 = vrot.lane.b32.xlu0 %v857_v21, %s1858_s9 }
  0x5e   : > { %801 = vrot.lane.b32.xlu1 %v854_v24, %s1858_s9 }
  0x60   : > { %795 = vrot.lane.b32.xlu0 %v851_v23, %s1858_s9 }
  0x62   : > { %741 = vrot.lane.b32.xlu1 %v860_v22, %s1860_s11 }
  0x64   : > { %735 = vrot.lane.b32.xlu0 %v857_v21, %s1860_s11 }
  0x66   : > { %729 = vrot.lane.b32.xlu1 %v854_v24, %s1860_s11 }
  0x68   : > { %723 = vrot.lane.b32.xlu0 %v851_v23, %s1860_s11 }
  0x6a   : > { %661 = vrot.lane.b32.xlu1 %v860_v22, %s1859_s10 }
  0x6c   : > { %655 = vrot.lane.b32.xlu0 %v857_v21, %s1859_s10 }
  0x6e   : > { %649 = vrot.lane.b32.xlu1 %v854_v24, %s1859_s10 }
  0x70   : > { %643 = vrot.lane.b32.xlu0 %v851_v23, %s1859_s10 }
  0x74   : > { %1153 = vrot.lane.b32.xlu0 %v1962_v25, %s1856_s7 }
  0x8c   : > { %v442_v31 = vpop.permute.xlu1 %441 }
  0x8e   : > { %v446_v29 = vpop.permute.xlu0 %445 }
  0x90   : > { %v379_v35 = vpop.permute.xlu1 %378 }
  0x92   : > { %v381_v33 = vpop.permute.xlu0 %380 }
  0x93   : > { %v384_v36 = vsel %vm382_vm0, %v379_v35, %v381_v33 }
  0x94   : > { %v388_v38 = vsel %vm1966_vm1, %v384_v36, 0.0  ;;  %v405_v43 = vpop.permute.xlu1 %404 }
  0x95   : > { %v392_v40 = vrot.slane %v388_v38, 4 }
  0x96   : > { %v444_v39 = vpop.permute.xlu0 %443 }
  0x97   : > { %v448_v41 = vsel %vm447_vm2, %v442_v31, %v444_v39  ;;  %v449_v42 = vsel %vm447_vm2, %v444_v39, %v446_v29  ;;  %396 = vst [vmem:[#allocation3 + $0x28] sm:$0xf0] %v392_v40  ;;  %v456_v40 = vld [vmem:[%s2699_s1] sm:$0xff] }
  0x98   : > { %v452_v44 = vsel %vm1971_vm3, %v448_v41, 0.0  ;;  %v453_v45 = vsel %vm1966_vm1, %v449_v42, 0.0  ;;  %v377_v49 = vpop.permute.xlu1 %376  ;;  %v457_v42 = vld [vmem:[%s2699_s1 + $0x8] sm:$0xff] }
  0x99   : > { %454 = vst [vmem:[#allocation3 + $0x40] sm:$0xf] %v452_v44  ;;  %455 = vst [vmem:[#allocation3 + $0x38] sm:$0xf] %v453_v45  ;;  %v383_v51 = vsel %vm382_vm0, %v377_v49, %v379_v35  ;;  %v459_v44 = vld [vmem:[%s2699_s1 + $0x18] sm:$0xff]  ;;  %v2038_v45 = vld [vmem:[#allocation4 + $0x40] sm:$0xff] }
  0x9a   : > { %v407_v47 = vpop.permute.xlu0 %406  ;;  %v387_v53 = vsel %vm1971_vm3, %v383_v51, 0.0  ;;  %1141 = vrot.lane.b32.xlu0 %v2038_v45, %s1856_s7 }
  0x9b   : > { %v410_v48 = vsel %vm408_vm4, %v405_v43, %v407_v47  ;;  %v391_v55 = vrot.slane %v387_v53, 4  ;;  %v2042_v47 = vld [vmem:[#allocation4 + $0x58] sm:$0xff] }
  0x9c   : > { %v414_v50 = vsel %vm1983_vm5, %v410_v48, 0.0  ;;  %v426_v57 = vpop.permute.xlu1 %425  ;;  %1147 = vrot.lane.b32.xlu1 %v2042_v47, %s1856_s7  ;;  %v2048_v48 = vld [vmem:[#allocation4 + $0x78] sm:$0xff] }
  0x9d   : > { %416 = vst [vmem:[#allocation3 + $0x20] sm:$0xf] %v414_v50  ;;  %395 = vst [vmem:[#allocation3 + $0x48] sm:$0xf0] %v391_v55 }
  0x9e   : > { %v403_v54 = vpop.permute.xlu0 %402  ;;  %v465_v20 = vld [vmem:[#allocation3 + $0x28] sm:$0xff]  ;;  %1073 = vrot.lane.b32.xlu0 %v1962_v25, %s1855_s6 }
  0x9f   : > { %v409_v56 = vsel %vm408_vm4, %v403_v54, %v405_v43  ;;  %v458_v43 = vld [vmem:[%s2699_s1 + $0x10] sm:$0xff] }
  0xa0   : > { %v413_v58 = vsel %vm1991_vm6, %v409_v56, 0.0  ;;  %v469_v59 = vld [vmem:[#allocation3 + $0x38] sm:$0xf]  ;;  %v468_v60 = vld [vmem:[#allocation3 + $0x40] sm:$0xf]  ;;  %v347_v63 = vpop.permute.xlu1 %346  ;;  %1135 = vrot.lane.b32.xlu1 %v2048_v48, %s1856_s7 }
  0xa1   : > { %415 = vst [vmem:[#allocation3 + $0x8] sm:$0xf] %v413_v58  ;;  %1751 = vmatprep.subr.msk.mxu0 %vm507_vm7, %v469_v59 }
  0xa2   : > { %v428_v61 = vpop.permute.xlu0 %427  ;;  %1752 = vmatpush1.msk.msra.mxu0 %vm507_vm7, %v468_v60  ;;  %1061 = vrot.lane.b32.xlu0 %v2038_v45, %s1855_s6 }
  0xa3   : > { %v431_v62 = vsel %vm429_vm8, %v426_v57, %v428_v61 }
  0xa4   : > { %435 = vst [vmem:[#allocation3 + $0x20] sm:$0xf0] %v431_v62  ;;  %v424_v2 = vpop.permute.xlu1 %423  ;;  %v464_v22 = vld [vmem:[#allocation3 + $0x48] sm:$0xff]  ;;  %1067 = vrot.lane.b32.xlu1 %v2042_v47, %s1855_s6 }
  0xa5   : > { %v430_v4 = vsel %vm429_vm8, %v424_v2, %v426_v57 }
  0xa6   : > { %v349_v0 = vpop.permute.xlu0 %348  ;;  %434 = vst [vmem:[#allocation3 + $0x8] sm:$0xf0] %v430_v4 }
  0xa7   : > { %v352_v1 = vsel %vm350_vm9, %v347_v63, %v349_v0 }
  0xa8   : > { %v356_v3 = vsel %vm1983_vm5, %v352_v1, 0.0  ;;  %v327_v9 = vpop.permute.xlu1 %326 }
  0xa9   : > { %v360_v5 = vrot.slane %v356_v3, 4 }
  0xaa   : > { %v345_v6 = vpop.permute.xlu0 %344 }
  0xab   : > { %364 = vst [vmem:[#allocation3 + $0x10] sm:$0xf0] %v360_v5  ;;  %v351_v7 = vsel %vm350_vm9, %v345_v6, %v347_v63  ;;  %v467_v8 = vld [vmem:[#allocation3 + $0x20] sm:$0xff] }
  0xac   : > { %v355_v10 = vsel %vm1991_vm6, %v351_v7, 0.0  ;;  %538 = vmatprep.subr.mxu0 %v467_v8  ;;  %v325_v14 = vpop.permute.xlu1 %324 }
  0xad   : > { %v359_v11 = vrot.slane %v355_v10, 4  ;;  %v331_v17 = vsel %vm330_vm10, %v325_v14, %v327_v9  ;;  %v466_v18 = vld [vmem:[#allocation3 + $0x8] sm:$0xff] }
  0xae   : > { %v329_v12 = vpop.permute.xlu0 %328  ;;  %v335_v19 = vsel %vm1971_vm3, %v331_v17, 0.0  ;;  %539 = vmatpush1.msra.mxu0 %v466_v18 }
  0xaf   : > { %363 = vst [vmem:[#allocation3 + $0x18] sm:$0xf0] %v359_v11  ;;  %v332_v13 = vsel %vm330_vm10, %v327_v9, %v329_v12  ;;  %337 = vst [vmem:[#allocation3 + $0x18] sm:$0xf] %v335_v19  ;;  %540 = vmatprep.subr.mxu0 %v465_v20 }
  0xb0   : > { %v336_v16 = vsel %vm1966_vm1, %v332_v13, 0.0  ;;  %v286_v23 = vpop.permute.xlu1 %285  ;;  %541 = vmatpush1.msra.mxu0 %v464_v22 }
  0xb1   : > { %338 = vst [vmem:[#allocation3 + $0x10] sm:$0xf] %v336_v16 }
  0xb2   : > { %v284_v21 = vpop.permute.xlu0 %283 }
  0xb3   : > { %v289_v24 = vsel %vm287_vm11, %v284_v21, %v286_v23 }
  0xb4   : > { %v293_v26 = vsel %vm1983_vm5, %v289_v24, 0.0  ;;  %v305_v29 = vpop.permute.xlu1 %304 }
  0xb5   : > { %295 = vst [vmem:[#allocation3] sm:$0xf] %v293_v26 }
  0xb6   : > { %v282_v27 = vpop.permute.xlu0 %281  ;;  %v462_v32 = vld [vmem:[#allocation3 + $0x18] sm:$0xff] }
  0xb7   : > { %v288_v28 = vsel %vm287_vm11, %v282_v27, %v284_v21 }
  0xb8   : > { %v292_v30 = vsel %vm1991_vm6, %v288_v28, 0.0  ;;  %v463_v31 = vld [vmem:[#allocation3 + $0x10] sm:$0xff]  ;;  %v303_v36 = vpop.permute.xlu1 %302 }
  0xb9   : > { %294 = vst [vmem:[#allocation3 + $0x30] sm:$0xf] %v292_v30  ;;  %542 = vmatprep.subr.mxu0 %v463_v31  ;;  %v309_v38 = vsel %vm308_vm12, %v303_v36, %v305_v29 }
  0xba   : > { %v307_v33 = vpop.permute.xlu0 %306  ;;  %543 = vmatpush1.msra.mxu0 %v462_v32  ;;  %313 = vst [vmem:[#allocation3 + $0x30] sm:$0xf0] %v309_v38 }
  0xbb   : > { %v310_v35 = vsel %vm308_vm12, %v305_v29, %v307_v33 }
  0xbc   : > { %314 = vst [vmem:[#allocation3] sm:$0xf0] %v310_v35 }
  0xc1   : > { %v460_v41 = vld [vmem:[#allocation3 + $0x30] sm:$0xff] }
  0xc3   : > { %v461_v39 = vld [vmem:[#allocation3] sm:$0xff] }
  0xc4   : > { %544 = vmatprep.subr.mxu0 %v461_v39 }
  0xc5   : > { %545 = vmatpush1.msra.mxu0 %v460_v41  ;;  %v487_v50 = vpop.permute.xlu1 %486 }
  0xc6   : > { %1753 = vmatmul.mubr.msk.f32.vlgmr.msra.gmra.mxu0 %vm494_vm13, %v456_v40 }
  0xc7   : > { %584 = vmatprep.mubr.f32.mxu0 %v2704_v15  ;;  %v492_v49 = vpop.permute.xlu0 %491 }
  0xc9   : > { %v482_v56 = vpop.permute.xlu1 %481 }
  0xca   : > { %1754 = vmatmul.mubr.msk.f32.gmra.mxu0 %vm494_vm13, %v457_v42 }
  0xcb   : > { %590 = vmatprep.mubr.f32.mxu0 %v2704_v15  ;;  %v477_v51 = vpop.permute.xlu0 %476 }
  0xcd   : > { %v2128_v17 = vpop.permute.xlu1 %893 }
  0xce   : > { %1755 = vmatmul.mubr.msk.f32.gmra.mxu0 %vm494_vm13, %v458_v43 }
  0xcf   : > { %596 = vmatprep.mubr.f32.mxu0 %v2704_v15  ;;  %v2116_v14 = vpop.permute.xlu0 %887 }
  0xd1   : > { %v2138_v19 = vpop.permute.xlu1 %881 }
  0xd2   : > { %1756 = vmatmul.mubr.msk.f32.gmra.mxu0 %vm494_vm13, %v459_v44 }
  0xd3   : > { %1605 = vmatprep.mubr.f32.mxu0 %v2704_v15  ;;  %v2124_v16 = vpop.permute.xlu0 %875 }
  0xd5   : > { %v2148_v21 = vpop.permute.xlu1 %813 }
  0xd7   : > { %v2134_v18 = vpop.permute.xlu0 %807 }
  0xd9   : > { %v2158_v23 = vpop.permute.xlu1 %801 }
  0xdb   : > { %v2144_v20 = vpop.permute.xlu0 %795 }
  0xdd   : > { %v2168_v26 = vpop.permute.xlu1 %741 }
  0xdf   : > { %v2154_v22 = vpop.permute.xlu0 %735 }
  0xe1   : > { %v2178_v28 = vpop.permute.xlu1 %729 }
  0xe3   : > { %v2164_v24 = vpop.permute.xlu0 %723 }
  0xe5   : > { %v2188_v30 = vpop.permute.xlu1 %661 }
  0xe7   : > { %v2174_v27 = vpop.permute.xlu0 %655 }
  0xe9   : > { %v2198_v32 = vpop.permute.xlu1 %649 }
  0xeb   : > { %v2184_v29 = vpop.permute.xlu0 %643 }
  0xef   : > { %v2194_v31 = vpop.permute.xlu0 %1153 }
 0x10c   : > { %v2204_v33 = vpop.permute.xlu0 %1141 }
 0x10e   : > { %v2208_v35 = vpop.permute.xlu1 %1147 }
 0x110   : > { %v2214_v36 = vpop.permute.xlu0 %1073 }
 0x112   : > { %v2218_v38 = vpop.permute.xlu1 %1135 }
 0x114   : > { %v2224_v39 = vpop.permute.xlu0 %1061 }
 0x116   : > { %v2228_v40 = vpop.permute.xlu1 %1067 }
 0x117   : > { %2731 = vst [vmem:[#allocation14_spill] sm:$0xff] %v2228_v40 }
 0x186   : > { %v580_v53 = vpop.f32.mrf.mxu0 }
 0x187   : > { %v581_v54 = vadd.f32 %v580_v53, %v477_v51 }
 0x188   : > { %v582_v55 = vpop.f32.mrf.mxu0 }
 0x189   : > { %v2056_v57 = vmax.f32 %v581_v54, 0.0  ;;  %v583_v58 = vadd.f32 %v582_v55, %v477_v51 }
 0x18a   : > { %v586_v59 = vpop.f32.mrf.mxu0 }
 0x18b   : > { %2723 = vst [vmem:[#allocation6_spill] sm:$0xff] %v2056_v57  ;;  %v2058_v60 = vmax.f32 %v583_v58, 0.0  ;;  %877 = vrot.lane.b32.xlu0 %v2056_v57, %s1857_s8  ;;  %v587_v61 = vadd.f32 %v586_v59, %v482_v56 }
 0x18c   : > { %v588_v62 = vpop.f32.mrf.mxu0 }
 0x18d   : > { %2724 = vst [vmem:[#allocation7_spill] sm:$0xff] %v2058_v60  ;;  %v589_v63 = vadd.f32 %v588_v62, %v482_v56  ;;  %v2062_v0 = vmax.f32 %v587_v61, 0.0  ;;  %879 = vrot.lane.b32.xlu1 %v2058_v60, %s1857_s8 }
 0x18e   : > { %v592_v1 = vpop.f32.mrf.mxu0 }
 0x18f   : > { %2725 = vst [vmem:[#allocation8_spill] sm:$0xff] %v2062_v0  ;;  %v593_v2 = vadd.f32 %v592_v1, %v487_v50  ;;  %v2066_v3 = vmax.f32 %v589_v63, 0.0  ;;  %797 = vrot.lane.b32.xlu0 %v2056_v57, %s1858_s9 }
 0x190   : > { %v594_v4 = vpop.f32.mrf.mxu0 }
 0x191   : > { %2726 = vst [vmem:[#allocation9_spill] sm:$0xff] %v2066_v3  ;;  %v2070_v5 = vmax.f32 %v593_v2, 0.0  ;;  %v595_v6 = vadd.f32 %v594_v4, %v487_v50  ;;  %799 = vrot.lane.b32.xlu1 %v2058_v60, %s1858_s9  ;;  %v1356_v2 = vld [vmem:[%s2702_s4 + $0x8] sm:$0xff] }
 0x192   : > { %v598_v7 = vpop.f32.mrf.mxu0 }
 0x193   : > { %2727 = vst [vmem:[#allocation10_spill] sm:$0xff] %v2070_v5  ;;  %v2074_v8 = vmax.f32 %v595_v6, 0.0  ;;  %v599_v9 = vadd.f32 %v598_v7, %v492_v49  ;;  %725 = vrot.lane.b32.xlu0 %v2056_v57, %s1860_s11  ;;  %v1358_v7 = vld [vmem:[%s2702_s4 + $0x18] sm:$0xff] }
 0x194   : > { %v600_v10 = vpop.f32.mrf.mxu0 }
 0x195   : > { %2728 = vst [vmem:[#allocation11_spill] sm:$0xff] %v2074_v8  ;;  %v2078_v11 = vmax.f32 %v599_v9, 0.0  ;;  %v601_v12 = vadd.f32 %v600_v10, %v492_v49  ;;  %727 = vrot.lane.b32.xlu1 %v2058_v60, %s1860_s11  ;;  %v1355_v10 = vld [vmem:[%s2702_s4] sm:$0xff] }
 0x197   : > { %2729 = vst [vmem:[#allocation12_spill] sm:$0xff] %v2078_v11  ;;  %v2082_v13 = vmax.f32 %v601_v12, 0.0  ;;  %645 = vrot.lane.b32.xlu0 %v2056_v57, %s1859_s10 }
 0x199   : > { %2730 = vst [vmem:[#allocation13_spill] sm:$0xff] %v2082_v13  ;;  %647 = vrot.lane.b32.xlu1 %v2058_v60, %s1859_s10 }
 0x19b   : > { %1131 = vrot.lane.b32.xlu0 %v2056_v57, %s1856_s7 }
 0x19d   : > { %883 = vrot.lane.b32.xlu1 %v2062_v0, %s1857_s8 }
 0x19f   : > { %1133 = vrot.lane.b32.xlu0 %v2058_v60, %s1856_s7 }
 0x1a1   : > { %803 = vrot.lane.b32.xlu1 %v2062_v0, %s1858_s9 }
 0x1a3   : > { %885 = vrot.lane.b32.xlu0 %v2066_v3, %s1857_s8 }
 0x1a5   : > { %731 = vrot.lane.b32.xlu1 %v2062_v0, %s1860_s11 }
 0x1a7   : > { %805 = vrot.lane.b32.xlu0 %v2066_v3, %s1858_s9 }
 0x1a9   : > { %651 = vrot.lane.b32.xlu1 %v2062_v0, %s1859_s10 }
 0x1ab   : > { %733 = vrot.lane.b32.xlu0 %v2066_v3, %s1860_s11 }
 0x1ad   : > { %1137 = vrot.lane.b32.xlu1 %v2062_v0, %s1856_s7 }
 0x1af   : > { %653 = vrot.lane.b32.xlu0 %v2066_v3, %s1859_s10 }
 0x1b1   : > { %1057 = vrot.lane.b32.xlu1 %v2062_v0, %s1855_s6 }
 0x1b3   : > { %889 = vrot.lane.b32.xlu0 %v2070_v5, %s1857_s8 }
 0x1b5   : > { %1139 = vrot.lane.b32.xlu1 %v2066_v3, %s1856_s7 }
 0x1b7   : > { %809 = vrot.lane.b32.xlu0 %v2070_v5, %s1858_s9 }
 0x1b9   : > { %1059 = vrot.lane.b32.xlu1 %v2066_v3, %s1855_s6 }
 0x1bb   : > { %737 = vrot.lane.b32.xlu0 %v2070_v5, %s1860_s11 }
 0x1bd   : > { %891 = vrot.lane.b32.xlu1 %v2074_v8, %s1857_s8 }
 0x1bf   : > { %657 = vrot.lane.b32.xlu0 %v2070_v5, %s1859_s10 }
 0x1c1   : > { %811 = vrot.lane.b32.xlu1 %v2074_v8, %s1858_s9 }
 0x1c3   : > { %1143 = vrot.lane.b32.xlu0 %v2070_v5, %s1856_s7 }
 0x1c5   : > { %739 = vrot.lane.b32.xlu1 %v2074_v8, %s1860_s11 }
 0x1c7   : > { %1063 = vrot.lane.b32.xlu0 %v2070_v5, %s1855_s6 }
 0x1c9   : > { %659 = vrot.lane.b32.xlu1 %v2074_v8, %s1859_s10 }
 0x1cb   : > { %1145 = vrot.lane.b32.xlu0 %v2074_v8, %s1856_s7 }
 0x1cd   : > { %895 = vrot.lane.b32.xlu1 %v2078_v11, %s1857_s8 }
 0x1cf   : > { %1065 = vrot.lane.b32.xlu0 %v2074_v8, %s1855_s6 }
 0x1d1   : > { %815 = vrot.lane.b32.xlu1 %v2078_v11, %s1858_s9 }
 0x1d3   : > { %897 = vrot.lane.b32.xlu0 %v2082_v13, %s1857_s8 }
 0x1d5   : > { %743 = vrot.lane.b32.xlu1 %v2078_v11, %s1860_s11 }
 0x1d7   : > { %1053 = vrot.lane.b32.xlu0 %v2058_v60, %s1855_s6 }
 0x1d9   : > { %663 = vrot.lane.b32.xlu1 %v2078_v11, %s1859_s10 }
 0x1db   : > { %817 = vrot.lane.b32.xlu0 %v2082_v13, %s1858_s9 }
 0x1dd   : > { %1149 = vrot.lane.b32.xlu1 %v2078_v11, %s1856_s7 }
 0x1df   : > { %1051 = vrot.lane.b32.xlu0 %v2056_v57, %s1855_s6 }
 0x1e1   : > { %1069 = vrot.lane.b32.xlu1 %v2078_v11, %s1855_s6 }
 0x1e3   : > { %745 = vrot.lane.b32.xlu0 %v2082_v13, %s1860_s11 }
 0x1e5   : > { %1055 = vrot.lane.b32.xlu1 %v2048_v48, %s1855_s6 }
 0x1e7   : > { %993 = vrot.lane.b32.xlu0 %v1962_v25, %s1854_s30 }
 0x1e9   : > { %989 = vrot.lane.b32.xlu1 %v2078_v11, %s1854_s30 }
 0x1eb   : > { %665 = vrot.lane.b32.xlu0 %v2082_v13, %s1859_s10 }
 0x1ed   : > { %987 = vrot.lane.b32.xlu1 %v2042_v47, %s1854_s30 }
 0x1ef   : > { %985 = vrot.lane.b32.xlu0 %v2074_v8, %s1854_s30 }
 0x1f1   : > { %979 = vrot.lane.b32.xlu1 %v2066_v3, %s1854_s30 }
 0x1f3   : > { %983 = vrot.lane.b32.xlu0 %v2070_v5, %s1854_s30 }
 0x1f5   : > { %977 = vrot.lane.b32.xlu1 %v2062_v0, %s1854_s30 }
 0x1f7   : > { %981 = vrot.lane.b32.xlu0 %v2038_v45, %s1854_s30 }
 0x1f9   : > { %975 = vrot.lane.b32.xlu1 %v2048_v48, %s1854_s30 }
 0x1fb   : > { %973 = vrot.lane.b32.xlu0 %v2058_v60, %s1854_s30 }
 0x1fd   : > { %1151 = vrot.lane.b32.xlu1 %v2082_v13, %s1856_s7  ;;  %v2234_v41 = vpop.permute.xlu0 %877 }
 0x1ff   : > { %v880_v42 = vpop.permute.xlu1 %879  ;;  %971 = vrot.lane.b32.xlu0 %v2056_v57, %s1854_s30 }
 0x200   : > { %v2240_v43 = vsel %vm350_vm9, %v2234_v41, %v880_v42  ;;  %v1360_v42 = vld [vmem:[%s2702_s4 + $0x28] sm:$0xff] }
 0x201   : > { %1221 = vrot.lane.b32.xlu1 %v2078_v11, %s1853_s29  ;;  %v2244_v44 = vpop.permute.xlu0 %797 }
 0x203   : > { %v800_v49 = vpop.permute.xlu1 %799  ;;  %1225 = vrot.lane.b32.xlu0 %v1962_v25, %s1853_s29 }
 0x204   : > { %v2250_v50 = vsel %vm330_vm10, %v2244_v44, %v800_v49 }
 0x205   : > { %1071 = vrot.lane.b32.xlu1 %v2082_v13, %s1855_s6  ;;  %v2254_v51 = vpop.permute.xlu0 %725 }
 0x207   : > { %v728_v53 = vpop.permute.xlu1 %727  ;;  %1217 = vrot.lane.b32.xlu0 %v2074_v8, %s1853_s29 }
 0x208   : > { %v2260_v54 = vsel %vm308_vm12, %v2254_v51, %v728_v53 }
 0x209   : > { %1219 = vrot.lane.b32.xlu1 %v2042_v47, %s1853_s29  ;;  %v2264_v25 = vpop.permute.xlu0 %645  ;;  %v1260_v47 = vld [vmem:[%s2701_s3 + $0x8] sm:$0xff] }
 0x20a   : > { %1492 = vmatprep.mubr.f32.mxu1 %v1260_v47 }
 0x20b   : > { %v648_v55 = vpop.permute.xlu1 %647  ;;  %1215 = vrot.lane.b32.xlu0 %v2070_v5, %s1853_s29 }
 0x20c   : > { %v2270_v56 = vsel %vm287_vm11, %v2264_v25, %v648_v55 }
 0x20d   : > { %991 = vrot.lane.b32.xlu1 %v2082_v13, %s1854_s30  ;;  %v1132_v58 = vpop.permute.xlu0 %1131 }
 0x20f   : > { %v2274_v59 = vpop.permute.xlu1 %883  ;;  %1213 = vrot.lane.b32.xlu0 %v2038_v45, %s1853_s29 }
 0x211   : > { %1211 = vrot.lane.b32.xlu1 %v2066_v3, %s1853_s29  ;;  %v2283_v61 = vpop.permute.xlu0 %1133 }
 0x212   : > { %v2287_v62 = vsel %vm429_vm8, %v1132_v58, %v2283_v61  ;;  %v1362_v58 = vld [vmem:[%s2702_s4 + $0x38] sm:$0xff] }
 0x213   : > { %v2289_v63 = vpop.permute.xlu1 %803  ;;  %1205 = vrot.lane.b32.xlu0 %v2058_v60, %s1853_s29 }
 0x215   : > { %1223 = vrot.lane.b32.xlu1 %v2082_v13, %s1853_s29  ;;  %v886_v45 = vpop.permute.xlu0 %885 }
 0x217   : > { %v2295_v1 = vpop.permute.xlu1 %731  ;;  %1203 = vrot.lane.b32.xlu0 %v2056_v57, %s1853_s29 }
 0x219   : > { %1209 = vrot.lane.b32.xlu1 %v2062_v0, %s1853_s29  ;;  %v2304_v4 = vpop.permute.xlu0 %805 }
 0x21b   : > { %v2306_v6 = vpop.permute.xlu1 %651  ;;  %1370 = vperm.xlu0 %1836, %v1356_v2   ;;  %v1359_v2 = vld [vmem:[%s2702_s4 + $0x20] sm:$0xff] }
 0x21d   : > { %1207 = vrot.lane.b32.xlu1 %v2048_v48, %s1853_s29  ;;  %v2313_v9 = vpop.permute.xlu0 %733  ;;  %v1357_v48 = vld [vmem:[%s2702_s4 + $0x10] sm:$0xff] }
 0x21f   : > { %v1138_v12 = vpop.permute.xlu1 %1137  ;;  %1380 = vperm.xlu0 %1836, %v1358_v7  }
 0x221   : > { %1365 = vperm.xlu1 %1837, %v1355_v10   ;;  %v654_v49 = vpop.permute.xlu0 %653 }
 0x222   : > { %v2323_v53 = vsel %vm287_vm11, %v2306_v6, %v654_v49 }
 0x223   : > { %v1058_v55 = vpop.permute.xlu1 %1057  ;;  %1390 = vperm.xlu0 %1836, %v1360_v42   ;;  %v1361_v42 = vld [vmem:[%s2702_s4 + $0x30] sm:$0xff] }
 0x225   : > { %1375 = vperm.xlu1 %1837, %v1357_v48   ;;  %v890_v47 = vpop.permute.xlu0 %889 }
 0x226   : > { %v903_v40 = vsel %vm350_vm9, %v2116_v14, %v890_v47 }
 0x227   : > { %v2334_v7 = vpop.permute.xlu1 %1139  ;;  %1400 = vperm.xlu0 %1836, %v1362_v58  }
 0x228   : > { %v2338_v10 = vsel %vm429_vm8, %v1138_v12, %v2334_v7 }
 0x229   : > { %1385 = vperm.xlu1 %1837, %v1359_v2   ;;  %v810_v49 = vpop.permute.xlu0 %809 }
 0x22b   : > { %v1060_v15 = vpop.permute.xlu1 %1059 }
 0x22c   : > { %v2344_v48 = vsel %vm408_vm4, %v1058_v55, %v1060_v15  ;;  %v2348_v57 = vsel %vm408_vm4, %v1060_v15, %v2224_v39 }
 0x22d   : > { %2732 = vst [vmem:[#allocation15_spill] sm:$0xff] %v2344_v48  ;;  %2733 = vst [vmem:[#allocation16_spill] sm:$0xff] %v2348_v57  ;;  %1395 = vperm.xlu1 %1837, %v1361_v42   ;;  %v738_v58 = vpop.permute.xlu0 %737 }
 0x22f   : > { %v892_v60 = vpop.permute.xlu1 %891 }
 0x231   : > { %v2350_v0 = vpop.permute.xlu0 %657 }
 0x233   : > { %v812_v12 = vpop.permute.xlu1 %811 }
 0x235   : > { %v2352_v2 = vpop.permute.xlu0 %1143 }
 0x237   : > { %v740_v3 = vpop.permute.xlu1 %739 }
 0x239   : > { %v2354_v5 = vpop.permute.xlu0 %1063 }
 0x23a   : > { %2734 = vst [vmem:[#allocation17_spill] sm:$0xff] %v2354_v5  ;;  %v904_v5 = vsel %vm350_vm9, %v890_v47, %v892_v60  ;;  %v901_v60 = vsel %vm350_vm9, %v2138_v19, %v2274_v59 }
 0x23b   : > { %v2356_v8 = vpop.permute.xlu1 %659 }
 0x23d   : > { %v2358_v11 = vpop.permute.xlu0 %1145 }
 0x23f   : > { %v896_v55 = vpop.permute.xlu1 %895 }
 0x240   : > { %v905_v57 = vsel %vm350_vm9, %v2128_v17, %v896_v55 }
 0x241   : > { %v2360_v13 = vpop.permute.xlu0 %1065 }
 0x242   : > { %2735 = vst [vmem:[#allocation18_spill] sm:$0xff] %v2360_v13 }
 0x243   : > { %v816_v15 = vpop.permute.xlu1 %815 }
 0x244   : > { %v825_v19 = vsel %vm330_vm10, %v2148_v21, %v816_v15  ;;  %v822_v21 = vsel %vm330_vm10, %v2289_v63, %v2304_v4 }
 0x245   : > { %v898_v39 = vpop.permute.xlu0 %897 }
 0x246   : > { %v906_v42 = vsel %vm350_vm9, %v896_v55, %v898_v39  ;;  %v902_v39 = vsel %vm350_vm9, %v2274_v59, %v886_v45  ;;  %v824_v59 = vsel %vm330_vm10, %v810_v49, %v812_v12 }
 0x247   : > { %v744_v48 = vpop.permute.xlu1 %743  ;;  %1769 = vmatprep.subr.msk.mxu1 %vm1983_vm5, %v906_v42  ;;  %v1159_v42 = vsel %vm429_vm8, %v2352_v2, %v2358_v11 }
 0x248   : > { %1770 = vmatpush1.msk.msra.mxu1 %vm1991_vm6, %v905_v57  ;;  %v899_v57 = vsel %vm350_vm9, %v2124_v16, %v2234_v41  ;;  %v823_v16 = vsel %vm330_vm10, %v2134_v18, %v810_v49  ;;  %v819_v18 = vsel %vm330_vm10, %v2144_v20, %v2244_v44  ;;  %v753_v47 = vsel %vm308_vm12, %v2168_v26, %v744_v48 }
 0x249   : > { %1771 = vmatprep.subr.msk.mxu1 %vm1983_vm5, %v904_v5  ;;  %v2374_v13 = vpop.permute.xlu0 %1053  ;;  %v752_v49 = vsel %vm308_vm12, %v738_v58, %v740_v3  ;;  %v751_v44 = vsel %vm308_vm12, %v2154_v22, %v738_v58  ;;  %v749_v26 = vsel %vm308_vm12, %v2178_v28, %v2295_v1  ;;  %v747_v22 = vsel %vm308_vm12, %v2164_v24, %v2254_v51 }
 0x24a   : > { %1772 = vmatpush1.msk.msra.mxu1 %vm1991_vm6, %v903_v40  ;;  %v672_v28 = vsel %vm287_vm11, %v2350_v0, %v2356_v8  ;;  %v671_v24 = vsel %vm287_vm11, %v2174_v27, %v2350_v0  ;;  %v667_v0 = vsel %vm287_vm11, %v2184_v29, %v2264_v25  ;;  %v1160_v25 = vsel %vm429_vm8, %v2358_v11, %v2208_v35 }
 0x24b   : > { %v664_v17 = vpop.permute.xlu1 %663  ;;  %1773 = vmatprep.subr.msk.mxu1 %vm1983_vm5, %v902_v39 }
 0x24c   : > { %1774 = vmatpush1.msk.msra.mxu1 %vm1991_vm6, %v901_v60  ;;  %v1156_v60 = vsel %vm429_vm8, %v2283_v61, %v2218_v38  ;;  %v2738_v38 = vld [vmem:[#allocation17_spill] sm:$0xff] }
 0x24d   : > { %1775 = vmatprep.subr.msk.mxu1 %vm1983_vm5, %v2240_v43  ;;  %v818_v5 = vpop.permute.xlu0 %817  ;;  %v821_v43 = vsel %vm330_vm10, %v2158_v23, %v2289_v63 }
 0x24e   : > { %v826_v14 = vsel %vm330_vm10, %v816_v15, %v818_v5  ;;  %1776 = vmatpush1.msk.msra.mxu1 %vm1991_vm6, %v899_v57 }
 0x24f   : > { %v1150_v40 = vpop.permute.xlu1 %1149  ;;  %1777 = vmatprep.subr.msk.mxu1 %vm1966_vm1, %v826_v14  ;;  %v2740_v14 = vld [vmem:[#allocation15_spill] sm:$0xff] }
 0x250   : > { %1778 = vmatpush1.msk.msra.mxu1 %vm1971_vm3, %v825_v19 }
 0x251   : > { %1779 = vmatprep.subr.msk.mxu1 %vm1966_vm1, %v824_v59  ;;  %v2407_v41 = vpop.permute.xlu0 %1051 }
 0x252   : > { %1780 = vmatpush1.msk.msra.mxu1 %vm1971_vm3, %v823_v16  ;;  %v1075_v19 = vsel %vm408_vm4, %v2407_v41, %v2374_v13 }
 0x253   : > { %v2417_v45 = vpop.permute.xlu1 %1069  ;;  %1781 = vmatprep.subr.msk.mxu1 %vm1966_vm1, %v822_v21 }
 0x254   : > { %1782 = vmatpush1.msk.msra.mxu1 %vm1971_vm3, %v821_v43 }
 0x255   : > { %1783 = vmatprep.subr.msk.mxu1 %vm1966_vm1, %v2250_v50  ;;  %v746_v4 = vpop.permute.xlu0 %745  ;;  %v750_v50 = vsel %vm308_vm12, %v2295_v1, %v2313_v9  ;;  %v673_v9 = vsel %vm287_vm11, %v2188_v30, %v664_v17  ;;  %v669_v30 = vsel %vm287_vm11, %v2198_v32, %v2306_v6 }
 0x256   : > { %1784 = vmatpush1.msk.msra.mxu1 %vm1971_vm3, %v819_v18  ;;  %v754_v23 = vsel %vm308_vm12, %v744_v48, %v746_v4 }
 0x257   : > { %v2432_v63 = vpop.permute.xlu1 %1055  ;;  %1444 = vmatprep.subr.mxu1 %v754_v23 }
 0x258   : > { %1445 = vmatpush1.msra.mxu1 %v753_v47  ;;  %v1076_v5 = vsel %vm408_vm4, %v2374_v13, %v2432_v63 }
 0x259   : > { %1446 = vmatprep.subr.mxu1 %v752_v49  ;;  %v2437_v20 = vpop.permute.xlu0 %993  ;;  %v2741_v49 = vld [vmem:[#allocation13_spill] sm:$0xff] }
 0x25a   : > { %1447 = vmatpush1.msra.mxu1 %v751_v44  ;;  %v2742_v44 = vld [vmem:[#allocation12_spill] sm:$0xff] }
 0x25b   : > { %v2444_v12 = vpop.permute.xlu1 %989  ;;  %1448 = vmatprep.subr.mxu1 %v750_v50 }
 0x25c   : > { %1449 = vmatpush1.msra.mxu1 %v749_v26  ;;  %v2743_v26 = vld [vmem:[#allocation11_spill] sm:$0xff] }
 0x25d   : > { %1450 = vmatprep.subr.mxu1 %v2260_v54  ;;  %v666_v3 = vpop.permute.xlu0 %665 }
 0x25e   : > { %v674_v48 = vsel %vm287_vm11, %v664_v17, %v666_v3  ;;  %1451 = vmatpush1.msra.mxu1 %v747_v22 }
 0x25f   : > { %v988_v58 = vpop.permute.xlu1 %987  ;;  %1785 = vmatprep.subr.msk.mxu1 %vm1983_vm5, %v674_v48  ;;  %v2744_v48 = vld [vmem:[#allocation10_spill] sm:$0xff] }
 0x260   : > { %1786 = vmatpush1.msk.msra.mxu1 %vm1991_vm6, %v673_v9  ;;  %v2745_v9 = vld [vmem:[#allocation9_spill] sm:$0xff] }
 0x261   : > { %1787 = vmatprep.subr.msk.mxu1 %vm1983_vm5, %v672_v28  ;;  %v986_v51 = vpop.permute.xlu0 %985  ;;  %v2746_v28 = vld [vmem:[#allocation8_spill] sm:$0xff] }
 0x262   : > { %1788 = vmatpush1.msk.msra.mxu1 %vm1991_vm6, %v671_v24  ;;  %v1000_v21 = vsel %vm382_vm0, %v986_v51, %v988_v58  ;;  %v1259_v24 = vld [vmem:[%s2701_s3] sm:$0xff] }
 0x263   : > { %v980_v54 = vpop.permute.xlu1 %979  ;;  %1789 = vmatprep.subr.msk.mxu1 %vm1983_vm5, %v2323_v53 }
 0x264   : > { %1790 = vmatpush1.msk.msra.mxu1 %vm1991_vm6, %v669_v30  ;;  %v2747_v30 = vld [vmem:[#allocation7_spill] sm:$0xff] }
 0x265   : > { %1791 = vmatprep.subr.msk.mxu1 %vm1983_vm5, %v2270_v56  ;;  %v984_v8 = vpop.permute.xlu0 %983 }
 0x266   : > { %1792 = vmatpush1.msk.msra.mxu1 %vm1991_vm6, %v667_v0  ;;  %v999_v46 = vsel %vm382_vm0, %v984_v8, %v986_v51  ;;  %v2748_v8 = vld [vmem:[#allocation6_spill] sm:$0xff] }
 0x267   : > { %v978_v27 = vpop.permute.xlu1 %977 }
 0x268   : > { %v997_v52 = vsel %vm382_vm0, %v978_v27, %v980_v54  ;;  %v1261_v27 = vld [vmem:[%s2701_s3 + $0x10] sm:$0xff] }
 0x269   : > { %v982_v32 = vpop.permute.xlu0 %981 }
 0x26a   : > { %v998_v41 = vsel %vm382_vm0, %v980_v54, %v982_v32  ;;  %v1263_v54 = vld [vmem:[%s2701_s3 + $0x20] sm:$0xff] }
 0x26b   : > { %v976_v1 = vpop.permute.xlu1 %975 }
 0x26d   : > { %v974_v6 = vpop.permute.xlu0 %973 }
 0x26f   : > { %v1152_v53 = vpop.permute.xlu1 %1151 }
 0x270   : > { %v1162_v55 = vsel %vm429_vm8, %v1152_v53, %v2194_v31  ;;  %v1161_v15 = vsel %vm429_vm8, %v1150_v40, %v1152_v53  ;;  %v1158_v31 = vsel %vm429_vm8, %v2334_v7, %v2204_v33  ;;  %v2736_v7 = vld [vmem:[#allocation14_spill] sm:$0xff]  ;;  %v2749_v53 = vmov 0.0  }
 0x271   : > { %1460 = vmatprep.subr.mxu1 %v1162_v55  ;;  %v972_v29 = vpop.permute.xlu0 %971  ;;  %v1269_v55 = vld [vmem:[%s2701_s3 + $0x50] sm:$0xff] }
 0x272   : > { %1461 = vmatpush2.msra.mxu1 %v1161_v15  ;;  %v995_v18 = vsel %vm382_vm0, %v972_v29, %v974_v6  ;;  %v1267_v15 = vld [vmem:[%s2701_s3 + $0x40] sm:$0xff]  ;;  %v1268_v29 = vld [vmem:[%s2701_s3 + $0x48] sm:$0xff] }
 0x273   : > { %v1222_v56 = vpop.permute.xlu1 %1221  ;;  %1462 = vmatprep.subr.mxu1 %v1160_v25  ;;  %v1272_v25 = vld [vmem:[%s2701_s3 + $0x68] sm:$0xff] }
 0x274   : > { %1463 = vmatpush2.msra.mxu1 %v1159_v42  ;;  %v1271_v42 = vld [vmem:[%s2701_s3 + $0x60] sm:$0xff] }
 0x275   : > { %1464 = vmatprep.subr.mxu1 %v1158_v31  ;;  %v1226_v39 = vpop.permute.xlu0 %1225  ;;  %v1275_v31 = vld [vmem:[%s2701_s3 + $0x80] sm:$0xff] }
 0x276   : > { %1465 = vmatpush2.msra.mxu1 %v2338_v10  ;;  %v2737_v10 = vld [vmem:[#allocation18_spill] sm:$0xff] }
 0x277   : > { %v1072_v35 = vpop.permute.xlu1 %1071  ;;  %1466 = vmatprep.subr.mxu1 %v1156_v60  ;;  %v1080_v2 = vsel %vm408_vm4, %v2737_v10, %v2736_v7  ;;  %v1079_v61 = vsel %vm408_vm4, %v2738_v38, %v2737_v10  ;;  %v1274_v60 = vld [vmem:[%s2701_s3 + $0x78] sm:$0xff]  ;;  %v1279_v7 = vld [vmem:[%s2701_s3 + $0xa0] sm:$0xff]  ;;  %v1280_v10 = vld [vmem:[%s2701_s3 + $0xa8] sm:$0xff] }
 0x278   : > { %v1081_v17 = vsel %vm408_vm4, %v2417_v45, %v1072_v35  ;;  %v1082_v11 = vsel %vm408_vm4, %v1072_v35, %v2214_v36  ;;  %1467 = vmatpush2.msra.mxu1 %v2287_v62  ;;  %v2739_v36 = vld [vmem:[#allocation16_spill] sm:$0xff]  ;;  %v996_v45 = vsel %vm382_vm0, %v974_v6, %v976_v1  ;;  %v1262_v1 = vld [vmem:[%s2701_s3 + $0x18] sm:$0xff] }
 0x279   : > { %1793 = vmatprep.subr.msk.mxu1 %vm1983_vm5, %v1082_v11  ;;  %v1218_v33 = vpop.permute.xlu0 %1217  ;;  %v1266_v6 = vld [vmem:[%s2701_s3 + $0x38] sm:$0xff]  ;;  %v1277_v11 = vld [vmem:[%s2701_s3 + $0x90] sm:$0xff] }
 0x27a   : > { %1794 = vmatpush2.msk.msra.mxu1 %vm1991_vm6, %v1081_v17  ;;  %v1278_v35 = vld [vmem:[%s2701_s3 + $0x98] sm:$0xff]  ;;  %v1276_v17 = vld [vmem:[%s2701_s3 + $0x88] sm:$0xff] }
 0x27b   : > { %v1220_v57 = vpop.permute.xlu1 %1219  ;;  %1795 = vmatprep.subr.msk.mxu1 %vm1983_vm5, %v1080_v2  ;;  %v1282_v2 = vld [vmem:[%s2701_s3 + $0xb8] sm:$0xff] }
 0x27c   : > { %1796 = vmatpush2.msk.msra.mxu1 %vm1991_vm6, %v1079_v61 }
 0x27d   : > { %1797 = vmatprep.subr.msk.mxu1 %vm1983_vm5, %v2739_v36  ;;  %v1216_v62 = vpop.permute.xlu0 %1215 }
 0x27e   : > { %1798 = vmatpush2.msk.msra.mxu1 %vm1991_vm6, %v2740_v14  ;;  %v1231_v50 = vsel %vm447_vm2, %v1216_v62, %v1218_v33 }
 0x27f   : > { %v992_v40 = vpop.permute.xlu1 %991  ;;  %1799 = vmatprep.subr.msk.mxu1 %vm1983_vm5, %v1076_v5 }
 0x280   : > { %v1001_v59 = vsel %vm382_vm0, %v2444_v12, %v992_v40  ;;  %v1002_v16 = vsel %vm382_vm0, %v992_v40, %v2437_v20  ;;  %1800 = vmatpush2.msk.msra.mxu1 %vm1991_vm6, %v1075_v19  ;;  %v1232_v20 = vsel %vm447_vm2, %v1218_v33, %v1220_v57  ;;  %v1281_v33 = vld [vmem:[%s2701_s3 + $0xb0] sm:$0xff] }
 0x281   : > { %1801 = vmatprep.subr.msk.mxu1 %vm1966_vm1, %v1002_v16  ;;  %v1214_v43 = vpop.permute.xlu0 %1213 }
 0x282   : > { %1802 = vmatpush2.msk.msra.mxu1 %vm1971_vm3, %v1001_v59 }
 0x283   : > { %v1212_v13 = vpop.permute.xlu1 %1211  ;;  %1803 = vmatprep.subr.msk.mxu1 %vm1966_vm1, %v1000_v21 }
 0x284   : > { %1804 = vmatpush2.msk.msra.mxu1 %vm1971_vm3, %v999_v46  ;;  %v1230_v3 = vsel %vm447_vm2, %v1212_v13, %v1214_v43 }
 0x285   : > { %1805 = vmatprep.subr.msk.mxu1 %vm1966_vm1, %v998_v41  ;;  %v1206_v23 = vpop.permute.xlu0 %1205 }
 0x286   : > { %1806 = vmatpush2.msk.msra.mxu1 %vm1971_vm3, %v997_v52 }
 0x287   : > { %v1224_v4 = vpop.permute.xlu1 %1223  ;;  %1807 = vmatprep.subr.msk.mxu1 %vm1966_vm1, %v996_v45 }
 0x288   : > { %v1233_v63 = vsel %vm447_vm2, %v1222_v56, %v1224_v4  ;;  %v1234_v47 = vsel %vm447_vm2, %v1224_v4, %v1226_v39  ;;  %1808 = vmatpush2.msk.msra.mxu1 %vm1971_vm3, %v995_v18  ;;  %v1270_v56 = vld [vmem:[%s2701_s3 + $0x58] sm:$0xff]  ;;  %v1273_v39 = vld [vmem:[%s2701_s3 + $0x70] sm:$0xff] }
 0x289   : > { %1484 = vmatprep.subr.mxu1 %v2741_v49  ;;  %1809 = vmatprep.subr.msk.mxu0 %vm1966_vm1, %v1234_v47  ;;  %v1204_v58 = vpop.permute.xlu0 %1203 }
 0x28a   : > { %1485 = vmatpush2.msra.mxu1 %v2742_v44  ;;  %1810 = vmatpush1.msk.msra.mxu0 %vm1971_vm3, %v1233_v63  ;;  %v1227_v32 = vsel %vm447_vm2, %v1204_v58, %v1206_v23 }
 0x28b   : > { %v1210_v12 = vpop.permute.xlu1 %1209  ;;  %1486 = vmatprep.subr.mxu1 %v2743_v26  ;;  %1811 = vmatprep.subr.msk.mxu0 %vm1966_vm1, %v1232_v20 }
 0x28c   : > { %v1229_v22 = vsel %vm447_vm2, %v1210_v12, %v1212_v13  ;;  %1487 = vmatpush2.msra.mxu1 %v2744_v48  ;;  %1812 = vmatpush1.msk.msra.mxu0 %vm1971_vm3, %v1231_v50 }
 0x28d   : > { %1488 = vmatprep.subr.mxu1 %v2745_v9  ;;  %1813 = vmatprep.subr.msk.mxu0 %vm1966_vm1, %v1230_v3 }
 0x28e   : > { %1489 = vmatpush2.msra.mxu1 %v2746_v28  ;;  %1814 = vmatpush1.msk.msra.mxu0 %vm1971_vm3, %v1229_v22 }
 0x28f   : > { %v1208_v51 = vpop.permute.xlu1 %1207  ;;  %1490 = vmatprep.subr.mxu1 %v2747_v30 }
 0x290   : > { %v1228_v0 = vsel %vm447_vm2, %v1206_v23, %v1208_v51  ;;  %1491 = vmatpush2.msra.mxu1 %v2748_v8 }
 0x291   : > { %1493 = vmatmul.mubr.f32.vlgmr.msra.gmra.mxu1 %v1259_v24  ;;  %1815 = vmatprep.subr.msk.mxu0 %vm1966_vm1, %v1228_v0 }
 0x292   : > { %1816 = vmatpush1.msk.msra.mxu0 %vm1971_vm3, %v1227_v32  ;;  %1498 = vmatprep.mubr.f32.mxu1 %v1263_v54 }
 0x293   : > { %1757 = vmatmul.mubr.msk.f32.vlgmr.msra.gmra.mxu0 %vm1403_vm14, %v1261_v27 }
 0x294   : > { %1611 = vmatprep.mubr.f32.mxu0 %v2749_v53 }
 0x295   : > { %1499 = vmatmul.mubr.f32.gmra.mxu1 %v1262_v1 }
 0x296   : > { %1504 = vmatprep.mubr.f32.mxu1 %v1266_v6  ;;  %v1371_v5 = vpop.permute.xlu0 %1370 }
 0x297   : > { %1758 = vmatmul.mubr.msk.f32.gmra.mxu0 %vm1403_vm14, %v1264_v34 }
 0x298   : > { %1617 = vmatprep.mubr.f32.mxu0 %v2749_v53 }
 0x299   : > { %1505 = vmatmul.mubr.f32.gmra.mxu1 %v1265_v37 }
 0x29a   : > { %1510 = vmatprep.mubr.f32.mxu1 %v1269_v55  ;;  %v1381_v50 = vpop.permute.xlu0 %1380 }
 0x29b   : > { %1759 = vmatmul.mubr.msk.f32.gmra.mxu0 %vm1403_vm14, %v1267_v15 }
 0x29c   : > { %1623 = vmatprep.mubr.f32.mxu0 %v2749_v53  ;;  %v1366_v38 = vpop.permute.xlu1 %1365 }
 0x29d   : > { %1511 = vmatmul.mubr.f32.gmra.mxu1 %v1268_v29 }
 0x29e   : > { %1516 = vmatprep.mubr.f32.mxu1 %v1272_v25  ;;  %v1391_v55 = vpop.permute.xlu0 %1390 }
 0x29f   : > { %1760 = vmatmul.mubr.msk.f32.gmra.mxu0 %vm1403_vm14, %v1270_v56 }
 0x2a0   : > { %1629 = vmatprep.mubr.f32.mxu0 %v2749_v53  ;;  %v1376_v41 = vpop.permute.xlu1 %1375 }
 0x2a1   : > { %1517 = vmatmul.mubr.f32.gmra.mxu1 %v1271_v42 }
 0x2a2   : > { %1522 = vmatprep.mubr.f32.mxu1 %v1275_v31 }
 0x2a3   : > { %1761 = vmatmul.mubr.msk.f32.gmra.mxu0 %vm1403_vm14, %v1273_v39 }
 0x2a4   : > { %1635 = vmatprep.mubr.f32.mxu0 %v2749_v53  ;;  %v1386_v30 = vpop.permute.xlu1 %1385 }
 0x2a5   : > { %1523 = vmatmul.mubr.f32.gmra.mxu1 %v1274_v60 }
 0x2a6   : > { %1528 = vmatprep.mubr.f32.mxu1 %v1278_v35 }
 0x2a7   : > { %1762 = vmatmul.mubr.msk.f32.gmra.mxu0 %vm1403_vm14, %v1276_v17 }
 0x2a8   : > { %1641 = vmatprep.mubr.f32.mxu0 %v2749_v53 }
 0x2a9   : > { %1529 = vmatmul.mubr.f32.gmra.mxu1 %v1277_v11  ;;  %v1396_v11 = vpop.permute.xlu1 %1395 }
 0x2aa   : > { %1534 = vmatprep.mubr.f32.mxu1 %v1281_v33 }
 0x2ab   : > { %1763 = vmatmul.mubr.msk.f32.gmra.mxu0 %vm1403_vm14, %v1279_v7 }
 0x2ac   : > { %1647 = vmatprep.mubr.f32.mxu0 %v2749_v53 }
 0x2ad   : > { %1535 = vmatmul.mubr.f32.gmra.mxu1 %v1280_v10 }
 0x2af   : > { %1764 = vmatmul.mubr.msk.f32.gmra.mxu0 %vm1403_vm14, %v1282_v2 }
 0x351   : > { %v1494_v61 = vpop.f32.mrf.mxu1 }
 0x352   : > { %v1495_v57 = vadd.f32 %v1494_v61, %v1366_v38 }
 0x353   : > { %v1496_v36 = vpop.f32.mrf.mxu1  ;;  %v1607_v62 = vpop.f32.mrf.mxu0 }
 0x354   : > { %v1497_v14 = vadd.f32 %v1496_v36, %v1366_v38  ;;  %v1608_v19 = vadd.f32 %v1607_v62, %v1495_v57 }
 0x355   : > { %v1500_v40 = vpop.f32.mrf.mxu1  ;;  %v1609_v59 = vpop.f32.mrf.mxu0 }
 0x356   : > { %v1654_v16 = vmax.f32 %v1608_v19, 0.0  ;;  %v1501_v21 = vadd.f32 %v1500_v40, %v1371_v5  ;;  %v1610_v43 = vadd.f32 %v1609_v59, %v1497_v14  ;;  %v1401_v14 = vpop.permute.xlu0 %1400 }
 0x357   : > { %v1502_v46 = vpop.f32.mrf.mxu1  ;;  %v1613_v13 = vpop.f32.mrf.mxu0 }
 0x358   : > { %1670 = vst [vmem:[%s1907_s28] sm:$0xff] %v1654_v16  ;;  %v1655_v52 = vmax.f32 %v1610_v43, 0.0  ;;  %v1503_v45 = vadd.f32 %v1502_v46, %v1371_v5  ;;  %v1614_v18 = vadd.f32 %v1613_v13, %v1501_v21 }
 0x359   : > { %v1506_v4 = vpop.f32.mrf.mxu1  ;;  %v1615_v23 = vpop.f32.mrf.mxu0 }
 0x35a   : > { %1671 = vst [vmem:[%s1907_s28 + $0x8] sm:$0xff] %v1655_v52  ;;  %v1656_v63 = vmax.f32 %v1614_v18, 0.0  ;;  %v1507_v47 = vadd.f32 %v1506_v4, %v1376_v41  ;;  %v1616_v49 = vadd.f32 %v1615_v23, %v1503_v45 }
 0x35b   : > { %v1508_v20 = vpop.f32.mrf.mxu1  ;;  %v1619_v44 = vpop.f32.mrf.mxu0 }
 0x35c   : > { %1672 = vst [vmem:[%s1907_s28 + $0x10] sm:$0xff] %v1656_v63  ;;  %v1657_v12 = vmax.f32 %v1616_v49, 0.0  ;;  %v1509_v26 = vadd.f32 %v1508_v20, %v1376_v41  ;;  %v1620_v3 = vadd.f32 %v1619_v44, %v1507_v47 }
 0x35d   : > { %v1512_v22 = vpop.f32.mrf.mxu1  ;;  %v1621_v48 = vpop.f32.mrf.mxu0 }
 0x35e   : > { %1673 = vst [vmem:[%s1907_s28 + $0x18] sm:$0xff] %v1657_v12  ;;  %v1658_v9 = vmax.f32 %v1620_v3, 0.0  ;;  %v1513_v58 = vadd.f32 %v1512_v22, %v1381_v50  ;;  %v1622_v28 = vadd.f32 %v1621_v48, %v1509_v26 }
 0x35f   : > { %v1514_v24 = vpop.f32.mrf.mxu1  ;;  %v1625_v51 = vpop.f32.mrf.mxu0 }
 0x360   : > { %1674 = vst [vmem:[%s1907_s28 + $0x20] sm:$0xff] %v1658_v9  ;;  %v1659_v54 = vmax.f32 %v1622_v28, 0.0  ;;  %v1515_v0 = vadd.f32 %v1514_v24, %v1381_v50  ;;  %v1626_v8 = vadd.f32 %v1625_v51, %v1513_v58 }
 0x361   : > { %v1518_v27 = vpop.f32.mrf.mxu1  ;;  %v1627_v32 = vpop.f32.mrf.mxu0 }
 0x362   : > { %1675 = vst [vmem:[%s1907_s28 + $0x28] sm:$0xff] %v1659_v54  ;;  %v1660_v1 = vmax.f32 %v1626_v8, 0.0  ;;  %v1519_v6 = vadd.f32 %v1518_v27, %v1386_v30  ;;  %v1628_v53 = vadd.f32 %v1627_v32, %v1515_v0 }
 0x363   : > { %v1520_v34 = vpop.f32.mrf.mxu1  ;;  %v1631_v37 = vpop.f32.mrf.mxu0 }
 0x364   : > { %1676 = vst [vmem:[%s1907_s28 + $0x30] sm:$0xff] %v1660_v1  ;;  %v1661_v15 = vmax.f32 %v1628_v53, 0.0  ;;  %v1521_v29 = vadd.f32 %v1520_v34, %v1386_v30  ;;  %v1632_v25 = vadd.f32 %v1631_v37, %v1519_v6 }
 0x365   : > { %v1524_v56 = vpop.f32.mrf.mxu1  ;;  %v1633_v42 = vpop.f32.mrf.mxu0 }
 0x366   : > { %1677 = vst [vmem:[%s1907_s28 + $0x38] sm:$0xff] %v1661_v15  ;;  %v1662_v31 = vmax.f32 %v1632_v25, 0.0  ;;  %v1525_v39 = vadd.f32 %v1524_v56, %v1391_v55  ;;  %v1634_v60 = vadd.f32 %v1633_v42, %v1521_v29 }
 0x367   : > { %v1526_v35 = vpop.f32.mrf.mxu1  ;;  %v1637_v17 = vpop.f32.mrf.mxu0 }
 0x368   : > { %1678 = vst [vmem:[%s1907_s28 + $0x40] sm:$0xff] %v1662_v31  ;;  %v1663_v33 = vmax.f32 %v1634_v60, 0.0  ;;  %v1527_v7 = vadd.f32 %v1526_v35, %v1391_v55  ;;  %v1638_v10 = vadd.f32 %v1637_v17, %v1525_v39 }
 0x369   : > { %v1530_v2 = vpop.f32.mrf.mxu1  ;;  %v1639_v38 = vpop.f32.mrf.mxu0 }
 0x36a   : > { %1679 = vst [vmem:[%s1907_s28 + $0x48] sm:$0xff] %v1663_v33  ;;  %v1664_v61 = vmax.f32 %v1638_v10, 0.0  ;;  %v1531_v57 = vadd.f32 %v1530_v2, %v1396_v11  ;;  %v1640_v36 = vadd.f32 %v1639_v38, %v1527_v7 }
 0x36b   : > { %v1532_v62 = vpop.f32.mrf.mxu1  ;;  %v1643_v5 = vpop.f32.mrf.mxu0 }
 0x36c   : > { %1680 = vst [vmem:[%s1907_s28 + $0x50] sm:$0xff] %v1664_v61  ;;  %v1665_v19 = vmax.f32 %v1640_v36, 0.0  ;;  %v1533_v40 = vadd.f32 %v1532_v62, %v1396_v11  ;;  %v1644_v59 = vadd.f32 %v1643_v5, %v1531_v57 }
 0x36d   : > { %v1536_v16 = vpop.f32.mrf.mxu1  ;;  %v1645_v21 = vpop.f32.mrf.mxu0 }
 0x36e   : > { %1681 = vst [vmem:[%s1907_s28 + $0x58] sm:$0xff] %v1665_v19  ;;  %v1666_v43 = vmax.f32 %v1644_v59, 0.0  ;;  %v1537_v46 = vadd.f32 %v1536_v16, %v1401_v14  ;;  %v1646_v13 = vadd.f32 %v1645_v21, %v1533_v40 }
 0x36f   : > { %v1538_v41 = vpop.f32.mrf.mxu1  ;;  %v1649_v52 = vpop.f32.mrf.mxu0 }
 0x370   : > { %1682 = vst [vmem:[%s1907_s28 + $0x60] sm:$0xff] %v1666_v43  ;;  %v1667_v45 = vmax.f32 %v1646_v13, 0.0  ;;  %v1539_v18 = vadd.f32 %v1538_v41, %v1401_v14  ;;  %v1650_v4 = vadd.f32 %v1649_v52, %v1537_v46 }
 0x371   : > { %v1651_v23 = vpop.f32.mrf.mxu0 }
 0x372   : > { %1683 = vst [vmem:[%s1907_s28 + $0x68] sm:$0xff] %v1667_v45  ;;  %v1668_v63 = vmax.f32 %v1650_v4, 0.0  ;;  %v1652_v47 = vadd.f32 %v1651_v23, %v1539_v18 }
 0x374   : > { %1684 = vst [vmem:[%s1907_s28 + $0x70] sm:$0xff] %v1668_v63  ;;  %v1669_v49 = vmax.f32 %v1652_v47, 0.0 }
 0x376   : > { %1685 = vst [vmem:[%s1907_s28 + $0x78] sm:$0xff] %v1669_v49 }
 0x377 PF: > { %s15_s18 = sadd.s32 1, %s1850_s18  }
 0x378   : > { %p12_p5 = scmp.ge.s32.totalorder %s15_s18, 4  }
 0x37a   :  { %14 = sbr.rel (!%p12_p5) target bundleno = 1 (0x1), region = 74 }

</bundles_post_ra>
